<compile_context>
chip_gen: v7x
topology: tpu7x:2x2x1
jax: 0.10.0
libtpu: 0.0.40
codegen_flags: <defaults>
</compile_context>

<pallas_src>
import functools

import jax
import jax.numpy as jnp
from jax.experimental import pallas as pl
from jax.experimental.pallas import tpu as pltpu

_CHUNK = 512  # lane-columns of the batch processed per unrolled inner step


def _mlp_kernel(x_ref, w1_ref, b1_ref, w2_ref, b2_ref, w3_ref, b3_ref, o_ref,
                *, chunk):
    # x_ref: [5, tile_b] bf16 (batch on lanes).  Weights [out, in] bf16,
    # biases [out, 1] f32.  o_ref: [1, tile_b] f32 (lane-dense).
    tile_b = x_ref.shape[1]
    n_chunks = tile_b // chunk

    # Statically unrolled chunk loop: per-chunk intermediates (h1 f32 [64,512]
    # = 32 vregs, h2 f32 [32,512] = 16 vregs) stay inside the vreg file, so no
    # spill store/load traffic.  Weights/biases are re-read from VMEM each
    # chunk (vld slots are idle here) instead of being pinned in vregs.
    for c in range(n_chunks):
        s = c * chunk

        xc = x_ref[:, s:s + chunk]                               # [5, chunk] bf16

        # Linear(5, 64) + ReLU   (Dropout is identity in eval)
        h1 = jnp.dot(w1_ref[...], xc,
                     preferred_element_type=jnp.float32) + b1_ref[...]
        h1 = jnp.maximum(h1, 0.0).astype(jnp.bfloat16)           # f32 VPU (v5e-safe)

        # Linear(64, 32) + ReLU  (Dropout is identity in eval)
        h2 = jnp.dot(w2_ref[...], h1,
                     preferred_element_type=jnp.float32) + b2_ref[...]
        h2 = jnp.maximum(h2, 0.0).astype(jnp.bfloat16)

        # Linear(32, 1) + Sigmoid (tanh form -> EUP, keeps the epilogue off
        # the VPU divide path)
        logits = jnp.dot(w3_ref[...], h2,
                         preferred_element_type=jnp.float32) + b3_ref[...]
        o_ref[:, s:s + chunk] = 0.5 * (jnp.tanh(0.5 * logits) + 1.0)


def _round_up(n, m):
    return ((n + m - 1) // m) * m


def _choose_tile_b(batch, desired):
    """Pick a lane-dense batch tile.

    * small batch (<= 512 rows): one tile covering everything.
    * otherwise: split into >= 2 roughly equal grid steps (so v7x's two
      TensorCores both get work), each a multiple of _CHUNK, capped at
      `desired` so per-step VMEM stays tiny and padding waste stays low.
    """
    b128 = _round_up(batch, 128)
    if b128 <= _CHUNK:
        return b128
    n_steps = max(2, -(-b128 // desired))          # ceil-div, at least 2 steps
    return _round_up(-(-b128 // n_steps), _CHUNK)  # multiple of _CHUNK


@functools.partial(jax.jit, static_argnames=("tile_b",))
def email_classifier_forward(x, params, tile_b=16384):
    """x: [B, 5] float32 -> [B, 1] float32 (sigmoid probabilities)."""
    w1, b1, w2, b2, w3, b3 = params
    B = x.shape[0]
    if B == 0:
        return jnp.zeros((0, 1), jnp.float32)

    tb = _choose_tile_b(B, tile_b)
    chunk = min(_CHUNK, tb)                        # tb is a multiple of chunk
    b_pad = _round_up(B, tb)

    # bf16 HBM->VMEM stream for activations/weights; accumulate in f32.
    # (cast/transpose/pad are fused into this same jit -> single dispatch)
    xt = x.astype(jnp.bfloat16).T                  # [5, B]  (batch on lanes)
    if b_pad != B:
        xt = jnp.pad(xt, ((0, 0), (0, b_pad - B)))
    w1b = w1.astype(jnp.bfloat16)
    w2b = w2.astype(jnp.bfloat16)
    w3b = w3.astype(jnp.bfloat16)

    # Weights/biases: full-extent blocks with constant index maps -> resident
    # in VMEM, not re-DMA'd per grid step.
    const = lambda a: pl.BlockSpec(a.shape, lambda i: (0, 0))

    out = pl.pallas_call(
        functools.partial(_mlp_kernel, chunk=chunk),
        out_shape=jax.ShapeDtypeStruct((1, b_pad), jnp.float32),
        grid=(b_pad // tb,),
        in_specs=[
            pl.BlockSpec((5, tb), lambda i: (0, i)),   # x tile (streamed)
            const(w1b), const(b1),
            const(w2b), const(b2),
            const(w3b), const(b3),
        ],
        out_specs=pl.BlockSpec((1, tb), lambda i: (0, i)),   # lane-dense output
        compiler_params=pltpu.CompilerParams(
            dimension_semantics=("parallel",),   # v7x: shard batch across both TCs
            vmem_limit_bytes=32 << 20,           # actual use is well under 2 MiB
        ),
    )(xt, w1b, b1, w2b, b2, w3b, b3)

    return out[0, :B].reshape(B, 1)


def init_params(key):
    """Deterministic init mimicking PyTorch Linear (U(-1/sqrt(fan_in), ...)).

    Weights stored in PyTorch-native [out, in] layout, biases as [out, 1].
    """
    dims = [(5, 64), (64, 32), (32, 1)]
    params = []
    for fan_in, fan_out in dims:
        key, kw, kb = jax.random.split(key, 3)
        bound = 1.0 / jnp.sqrt(float(fan_in))
        w = jax.random.uniform(kw, (fan_out, fan_in), jnp.float32, -bound, bound)
        b = jax.random.uniform(kb, (fan_out, 1), jnp.float32, -bound, bound)
        params += [w, b]
    return tuple(params)


def _reference_forward(x, params):
    """Pure-JAX reference with the same bf16 input casts / f32 accumulation."""
    w1, b1, w2, b2, w3, b3 = params
    xb = x.astype(jnp.bfloat16)
    h1 = jnp.maximum(
        jnp.dot(xb, w1.astype(jnp.bfloat16).T,
                preferred_element_type=jnp.float32) + b1.T, 0.0)
    h2 = jnp.maximum(
        jnp.dot(h1.astype(jnp.bfloat16), w2.astype(jnp.bfloat16).T,
                preferred_element_type=jnp.float32) + b2.T, 0.0)
    logits = jnp.dot(h2.astype(jnp.bfloat16), w3.astype(jnp.bfloat16).T,
                     preferred_element_type=jnp.float32) + b3.T
    return jax.nn.sigmoid(logits)


if __name__ == "__main__":
    key = jax.random.PRNGKey(0)
    key, kx = jax.random.split(key)

    # B = 3000: not a multiple of 128 -> exercises padding; large enough to
    # exercise the multi-step grid (2 steps of 1536) and the in-kernel
    # 512-column chunk loop (3 chunks per step).
    B = 3000
    x = jax.random.normal(kx, (B, 5), jnp.float32)
    params = init_params(key)

    out = email_classifier_forward(x, params)
    out = jax.block_until_ready(out)

    ref = _reference_forward(x, params)
    assert out.shape == (B, 1)
    assert jnp.allclose(out, ref, atol=2e-3, rtol=2e-3), (
        float(jnp.max(jnp.abs(out - ref))))

    print("KERNEL_OK")
</pallas_src>

<mosaic_0001>
module attributes {stable_mosaic.version = 11 : i64} {
  func.func @_mlp_kernel(%arg0: i32, %arg1: memref<5x1536xbf16, #tpu.memory_space<vmem>>, %arg2: memref<64x5xbf16, #tpu.memory_space<vmem>>, %arg3: memref<64x1xf32, #tpu.memory_space<vmem>>, %arg4: memref<32x64xbf16, #tpu.memory_space<vmem>>, %arg5: memref<32x1xf32, #tpu.memory_space<vmem>>, %arg6: memref<1x32xbf16, #tpu.memory_space<vmem>>, %arg7: memref<1x1xf32, #tpu.memory_space<vmem>>, %arg8: memref<1x1536xf32, #tpu.memory_space<vmem>>) attributes {dimension_semantics = [#tpu.dimension_semantics<parallel>], iteration_bounds = array<i64: 2>, scalar_prefetch = 0 : i64, scratch_operands = 0 : i64, tpu.core_type = #tpu.core_type<tc>, window_params = [{transform_indices = @transform_0, window_bounds = array<i64: 5, 1536>}, {pipeline_mode = #tpu.pipeline_mode<synchronous>, transform_indices = @transform_1, window_bounds = array<i64: 64, 5>}, {pipeline_mode = #tpu.pipeline_mode<synchronous>, transform_indices = @transform_2, window_bounds = array<i64: 64, 1>}, {pipeline_mode = #tpu.pipeline_mode<synchronous>, transform_indices = @transform_3, window_bounds = array<i64: 32, 64>}, {pipeline_mode = #tpu.pipeline_mode<synchronous>, transform_indices = @transform_4, window_bounds = array<i64: 32, 1>}, {pipeline_mode = #tpu.pipeline_mode<synchronous>, transform_indices = @transform_5, window_bounds = array<i64: 1, 32>}, {pipeline_mode = #tpu.pipeline_mode<synchronous>, transform_indices = @transform_6, window_bounds = array<i64: 1, 1>}, {transform_indices = @transform_7, window_bounds = array<i64: 1, 1536>}]} {
    %c0 = arith.constant 0 : index
    %c0_0 = arith.constant 0 : index
    %0 = vector.load %arg1[%c0, %c0_0] : memref<5x1536xbf16, #tpu.memory_space<vmem>>, vector<5x512xbf16>
    %c0_1 = arith.constant 0 : index
    %c0_2 = arith.constant 0 : index
    %1 = vector.load %arg2[%c0_1, %c0_2] : memref<64x5xbf16, #tpu.memory_space<vmem>>, vector<64x5xbf16>
    %cst = arith.constant dense<0.000000e+00> : vector<64x512xf32>
    %2 = tpu.matmul %1, %0, %cst {dimension_numbers = #tpu.dot_dimension_numbers<[1], [0], [0], [1], [0, 0, 1, 1], [], []>} : vector<64x5xbf16>, vector<5x512xbf16>, vector<64x512xf32> -> vector<64x512xf32>
    %c0_3 = arith.constant 0 : index
    %c0_4 = arith.constant 0 : index
    %3 = vector.load %arg3[%c0_3, %c0_4] : memref<64x1xf32, #tpu.memory_space<vmem>>, vector<64x1xf32>
    %4 = vector.broadcast %3 : vector<64x1xf32> to vector<64x512xf32>
    %5 = arith.addf %2, %4 : vector<64x512xf32>
    %cst_5 = arith.constant 0.000000e+00 : f32
    %6 = vector.broadcast %cst_5 : f32 to vector<64x512xf32>
    %7 = arith.maximumf %5, %6 : vector<64x512xf32>
    %8 = arith.truncf %7 : vector<64x512xf32> to vector<64x512xbf16>
    %c0_6 = arith.constant 0 : index
    %c0_7 = arith.constant 0 : index
    %9 = vector.load %arg4[%c0_6, %c0_7] : memref<32x64xbf16, #tpu.memory_space<vmem>>, vector<32x64xbf16>
    %cst_8 = arith.constant dense<0.000000e+00> : vector<32x512xf32>
    %10 = tpu.matmul %9, %8, %cst_8 {dimension_numbers = #tpu.dot_dimension_numbers<[1], [0], [0], [1], [0, 0, 1, 1], [], []>} : vector<32x64xbf16>, vector<64x512xbf16>, vector<32x512xf32> -> vector<32x512xf32>
    %c0_9 = arith.constant 0 : index
    %c0_10 = arith.constant 0 : index
    %11 = vector.load %arg5[%c0_9, %c0_10] : memref<32x1xf32, #tpu.memory_space<vmem>>, vector<32x1xf32>
    %12 = vector.broadcast %11 : vector<32x1xf32> to vector<32x512xf32>
    %13 = arith.addf %10, %12 : vector<32x512xf32>
    %cst_11 = arith.constant 0.000000e+00 : f32
    %14 = vector.broadcast %cst_11 : f32 to vector<32x512xf32>
    %15 = arith.maximumf %13, %14 : vector<32x512xf32>
    %16 = arith.truncf %15 : vector<32x512xf32> to vector<32x512xbf16>
    %c0_12 = arith.constant 0 : index
    %c0_13 = arith.constant 0 : index
    %17 = vector.load %arg6[%c0_12, %c0_13] : memref<1x32xbf16, #tpu.memory_space<vmem>>, vector<1x32xbf16>
    %cst_14 = arith.constant dense<0.000000e+00> : vector<1x512xf32>
    %18 = tpu.matmul %17, %16, %cst_14 {dimension_numbers = #tpu.dot_dimension_numbers<[1], [0], [0], [1], [0, 0, 1, 1], [], []>} : vector<1x32xbf16>, vector<32x512xbf16>, vector<1x512xf32> -> vector<1x512xf32>
    %c0_15 = arith.constant 0 : index
    %c0_16 = arith.constant 0 : index
    %19 = vector.load %arg7[%c0_15, %c0_16] : memref<1x1xf32, #tpu.memory_space<vmem>>, vector<1x1xf32>
    %20 = vector.broadcast %19 : vector<1x1xf32> to vector<1x512xf32>
    %21 = arith.addf %18, %20 : vector<1x512xf32>
    %cst_17 = arith.constant 5.000000e-01 : f32
    %22 = vector.broadcast %cst_17 : f32 to vector<1x512xf32>
    %23 = arith.mulf %22, %21 : vector<1x512xf32>
    %24 = math.tanh %23 : vector<1x512xf32>
    %cst_18 = arith.constant 1.000000e+00 : f32
    %25 = vector.broadcast %cst_18 : f32 to vector<1x512xf32>
    %26 = arith.addf %24, %25 : vector<1x512xf32>
    %cst_19 = arith.constant 5.000000e-01 : f32
    %27 = vector.broadcast %cst_19 : f32 to vector<1x512xf32>
    %28 = arith.mulf %27, %26 : vector<1x512xf32>
    %c0_20 = arith.constant 0 : index
    %c0_21 = arith.constant 0 : index
    %29 = vector.load %arg8[%c0_20, %c0_21] : memref<1x1536xf32, #tpu.memory_space<vmem>>, vector<1x512xf32>
    tpu.vector_store %arg8[%c0_20, %c0_21], %28 {strides = array<i32>} : memref<1x1536xf32, #tpu.memory_space<vmem>>, vector<1x512xf32>,
    %c0_22 = arith.constant 0 : index
    %c512 = arith.constant 512 : index
    %30 = vector.load %arg1[%c0_22, %c512] : memref<5x1536xbf16, #tpu.memory_space<vmem>>, vector<5x512xbf16>
    %c0_23 = arith.constant 0 : index
    %c0_24 = arith.constant 0 : index
    %31 = vector.load %arg2[%c0_23, %c0_24] : memref<64x5xbf16, #tpu.memory_space<vmem>>, vector<64x5xbf16>
    %cst_25 = arith.constant dense<0.000000e+00> : vector<64x512xf32>
    %32 = tpu.matmul %31, %30, %cst_25 {dimension_numbers = #tpu.dot_dimension_numbers<[1], [0], [0], [1], [0, 0, 1, 1], [], []>} : vector<64x5xbf16>, vector<5x512xbf16>, vector<64x512xf32> -> vector<64x512xf32>
    %c0_26 = arith.constant 0 : index
    %c0_27 = arith.constant 0 : index
    %33 = vector.load %arg3[%c0_26, %c0_27] : memref<64x1xf32, #tpu.memory_space<vmem>>, vector<64x1xf32>
    %34 = vector.broadcast %33 : vector<64x1xf32> to vector<64x512xf32>
    %35 = arith.addf %32, %34 : vector<64x512xf32>
    %cst_28 = arith.constant 0.000000e+00 : f32
    %36 = vector.broadcast %cst_28 : f32 to vector<64x512xf32>
    %37 = arith.maximumf %35, %36 : vector<64x512xf32>
    %38 = arith.truncf %37 : vector<64x512xf32> to vector<64x512xbf16>
    %c0_29 = arith.constant 0 : index
    %c0_30 = arith.constant 0 : index
    %39 = vector.load %arg4[%c0_29, %c0_30] : memref<32x64xbf16, #tpu.memory_space<vmem>>, vector<32x64xbf16>
    %cst_31 = arith.constant dense<0.000000e+00> : vector<32x512xf32>
    %40 = tpu.matmul %39, %38, %cst_31 {dimension_numbers = #tpu.dot_dimension_numbers<[1], [0], [0], [1], [0, 0, 1, 1], [], []>} : vector<32x64xbf16>, vector<64x512xbf16>, vector<32x512xf32> -> vector<32x512xf32>
    %c0_32 = arith.constant 0 : index
    %c0_33 = arith.constant 0 : index
    %41 = vector.load %arg5[%c0_32, %c0_33] : memref<32x1xf32, #tpu.memory_space<vmem>>, vector<32x1xf32>
    %42 = vector.broadcast %41 : vector<32x1xf32> to vector<32x512xf32>
    %43 = arith.addf %40, %42 : vector<32x512xf32>
    %cst_34 = arith.constant 0.000000e+00 : f32
    %44 = vector.broadcast %cst_34 : f32 to vector<32x512xf32>
    %45 = arith.maximumf %43, %44 : vector<32x512xf32>
    %46 = arith.truncf %45 : vector<32x512xf32> to vector<32x512xbf16>
    %c0_35 = arith.constant 0 : index
    %c0_36 = arith.constant 0 : index
    %47 = vector.load %arg6[%c0_35, %c0_36] : memref<1x32xbf16, #tpu.memory_space<vmem>>, vector<1x32xbf16>
    %cst_37 = arith.constant dense<0.000000e+00> : vector<1x512xf32>
    %48 = tpu.matmul %47, %46, %cst_37 {dimension_numbers = #tpu.dot_dimension_numbers<[1], [0], [0], [1], [0, 0, 1, 1], [], []>} : vector<1x32xbf16>, vector<32x512xbf16>, vector<1x512xf32> -> vector<1x512xf32>
    %c0_38 = arith.constant 0 : index
    %c0_39 = arith.constant 0 : index
    %49 = vector.load %arg7[%c0_38, %c0_39] : memref<1x1xf32, #tpu.memory_space<vmem>>, vector<1x1xf32>
    %50 = vector.broadcast %49 : vector<1x1xf32> to vector<1x512xf32>
    %51 = arith.addf %48, %50 : vector<1x512xf32>
    %cst_40 = arith.constant 5.000000e-01 : f32
    %52 = vector.broadcast %cst_40 : f32 to vector<1x512xf32>
    %53 = arith.mulf %52, %51 : vector<1x512xf32>
    %54 = math.tanh %53 : vector<1x512xf32>
    %cst_41 = arith.constant 1.000000e+00 : f32
    %55 = vector.broadcast %cst_41 : f32 to vector<1x512xf32>
    %56 = arith.addf %54, %55 : vector<1x512xf32>
    %cst_42 = arith.constant 5.000000e-01 : f32
    %57 = vector.broadcast %cst_42 : f32 to vector<1x512xf32>
    %58 = arith.mulf %57, %56 : vector<1x512xf32>
    %c0_43 = arith.constant 0 : index
    %c512_44 = arith.constant 512 : index
    %59 = vector.load %arg8[%c0_43, %c512_44] : memref<1x1536xf32, #tpu.memory_space<vmem>>, vector<1x512xf32>
    tpu.vector_store %arg8[%c0_43, %c512_44], %58 {strides = array<i32>} : memref<1x1536xf32, #tpu.memory_space<vmem>>, vector<1x512xf32>,
    %c0_45 = arith.constant 0 : index
    %c1024 = arith.constant 1024 : index
    %60 = vector.load %arg1[%c0_45, %c1024] : memref<5x1536xbf16, #tpu.memory_space<vmem>>, vector<5x512xbf16>
    %c0_46 = arith.constant 0 : index
    %c0_47 = arith.constant 0 : index
    %61 = vector.load %arg2[%c0_46, %c0_47] : memref<64x5xbf16, #tpu.memory_space<vmem>>, vector<64x5xbf16>
    %cst_48 = arith.constant dense<0.000000e+00> : vector<64x512xf32>
    %62 = tpu.matmul %61, %60, %cst_48 {dimension_numbers = #tpu.dot_dimension_numbers<[1], [0], [0], [1], [0, 0, 1, 1], [], []>} : vector<64x5xbf16>, vector<5x512xbf16>, vector<64x512xf32> -> vector<64x512xf32>
    %c0_49 = arith.constant 0 : index
    %c0_50 = arith.constant 0 : index
    %63 = vector.load %arg3[%c0_49, %c0_50] : memref<64x1xf32, #tpu.memory_space<vmem>>, vector<64x1xf32>
    %64 = vector.broadcast %63 : vector<64x1xf32> to vector<64x512xf32>
    %65 = arith.addf %62, %64 : vector<64x512xf32>
    %cst_51 = arith.constant 0.000000e+00 : f32
    %66 = vector.broadcast %cst_51 : f32 to vector<64x512xf32>
    %67 = arith.maximumf %65, %66 : vector<64x512xf32>
    %68 = arith.truncf %67 : vector<64x512xf32> to vector<64x512xbf16>
    %c0_52 = arith.constant 0 : index
    %c0_53 = arith.constant 0 : index
    %69 = vector.load %arg4[%c0_52, %c0_53] : memref<32x64xbf16, #tpu.memory_space<vmem>>, vector<32x64xbf16>
    %cst_54 = arith.constant dense<0.000000e+00> : vector<32x512xf32>
    %70 = tpu.matmul %69, %68, %cst_54 {dimension_numbers = #tpu.dot_dimension_numbers<[1], [0], [0], [1], [0, 0, 1, 1], [], []>} : vector<32x64xbf16>, vector<64x512xbf16>, vector<32x512xf32> -> vector<32x512xf32>
    %c0_55 = arith.constant 0 : index
    %c0_56 = arith.constant 0 : index
    %71 = vector.load %arg5[%c0_55, %c0_56] : memref<32x1xf32, #tpu.memory_space<vmem>>, vector<32x1xf32>
    %72 = vector.broadcast %71 : vector<32x1xf32> to vector<32x512xf32>
    %73 = arith.addf %70, %72 : vector<32x512xf32>
    %cst_57 = arith.constant 0.000000e+00 : f32
    %74 = vector.broadcast %cst_57 : f32 to vector<32x512xf32>
    %75 = arith.maximumf %73, %74 : vector<32x512xf32>
    %76 = arith.truncf %75 : vector<32x512xf32> to vector<32x512xbf16>
    %c0_58 = arith.constant 0 : index
    %c0_59 = arith.constant 0 : index
    %77 = vector.load %arg6[%c0_58, %c0_59] : memref<1x32xbf16, #tpu.memory_space<vmem>>, vector<1x32xbf16>
    %cst_60 = arith.constant dense<0.000000e+00> : vector<1x512xf32>
    %78 = tpu.matmul %77, %76, %cst_60 {dimension_numbers = #tpu.dot_dimension_numbers<[1], [0], [0], [1], [0, 0, 1, 1], [], []>} : vector<1x32xbf16>, vector<32x512xbf16>, vector<1x512xf32> -> vector<1x512xf32>
    %c0_61 = arith.constant 0 : index
    %c0_62 = arith.constant 0 : index
    %79 = vector.load %arg7[%c0_61, %c0_62] : memref<1x1xf32, #tpu.memory_space<vmem>>, vector<1x1xf32>
    %80 = vector.broadcast %79 : vector<1x1xf32> to vector<1x512xf32>
    %81 = arith.addf %78, %80 : vector<1x512xf32>
    %cst_63 = arith.constant 5.000000e-01 : f32
    %82 = vector.broadcast %cst_63 : f32 to vector<1x512xf32>
    %83 = arith.mulf %82, %81 : vector<1x512xf32>
    %84 = math.tanh %83 : vector<1x512xf32>
    %cst_64 = arith.constant 1.000000e+00 : f32
    %85 = vector.broadcast %cst_64 : f32 to vector<1x512xf32>
    %86 = arith.addf %84, %85 : vector<1x512xf32>
    %cst_65 = arith.constant 5.000000e-01 : f32
    %87 = vector.broadcast %cst_65 : f32 to vector<1x512xf32>
    %88 = arith.mulf %87, %86 : vector<1x512xf32>
    %c0_66 = arith.constant 0 : index
    %c1024_67 = arith.constant 1024 : index
    %89 = vector.load %arg8[%c0_66, %c1024_67] : memref<1x1536xf32, #tpu.memory_space<vmem>>, vector<1x512xf32>
    tpu.vector_store %arg8[%c0_66, %c1024_67], %88 {strides = array<i32>} : memref<1x1536xf32, #tpu.memory_space<vmem>>, vector<1x512xf32>,
    return
  }
  func.func @transform_0(%arg0: i32) -> (i32, i32) {
    %c0_i32 = arith.constant 0 : i32
    %c0_i32_0 = arith.constant 0 : i32
    return %c0_i32, %arg0 : i32, i32
  }
  func.func @transform_1(%arg0: i32) -> (i32, i32) {
    %c0_i32 = arith.constant 0 : i32
    %c0_i32_0 = arith.constant 0 : i32
    %c0_i32_1 = arith.constant 0 : i32
    return %c0_i32, %c0_i32_0 : i32, i32
  }
  func.func @transform_2(%arg0: i32) -> (i32, i32) {
    %c0_i32 = arith.constant 0 : i32
    %c0_i32_0 = arith.constant 0 : i32
    %c0_i32_1 = arith.constant 0 : i32
    return %c0_i32, %c0_i32_0 : i32, i32
  }
  func.func @transform_3(%arg0: i32) -> (i32, i32) {
    %c0_i32 = arith.constant 0 : i32
    %c0_i32_0 = arith.constant 0 : i32
    %c0_i32_1 = arith.constant 0 : i32
    return %c0_i32, %c0_i32_0 : i32, i32
  }
  func.func @transform_4(%arg0: i32) -> (i32, i32) {
    %c0_i32 = arith.constant 0 : i32
    %c0_i32_0 = arith.constant 0 : i32
    %c0_i32_1 = arith.constant 0 : i32
    return %c0_i32, %c0_i32_0 : i32, i32
  }
  func.func @transform_5(%arg0: i32) -> (i32, i32) {
    %c0_i32 = arith.constant 0 : i32
    %c0_i32_0 = arith.constant 0 : i32
    %c0_i32_1 = arith.constant 0 : i32
    return %c0_i32, %c0_i32_0 : i32, i32
  }
  func.func @transform_6(%arg0: i32) -> (i32, i32) {
    %c0_i32 = arith.constant 0 : i32
    %c0_i32_0 = arith.constant 0 : i32
    %c0_i32_1 = arith.constant 0 : i32
    return %c0_i32, %c0_i32_0 : i32, i32
  }
  func.func @transform_7(%arg0: i32) -> (i32, i32) {
    %c0_i32 = arith.constant 0 : i32
    %c0_i32_0 = arith.constant 0 : i32
    return %c0_i32, %arg0 : i32, i32
  }
}

</mosaic_0001>

<bundles_post_ra>
// kernel: email_classifier_forward.1
= control target key start
LH: loop header
LB: loop body
LE: loop exit
PB: predicated region body
PF: predicated region fallthrough
CT: control target
= control target key end

     0   :  { %s2411_s26 = smov 0   ;;  %s2797_s0 = inlined_call_operand.vmem [shape: bf16[5,3072], index: 0, kind: input, shape index: {}]   ;;  %s2798_s1 = inlined_call_operand.vmem [shape: bf16[64,5], index: 1, kind: input, shape index: {}]   ;;  %s2799_s2 = inlined_call_operand.vmem [shape: f32[64,1], index: 2, kind: input, shape index: {}]   ;;  %s2800_s3 = inlined_call_operand.vmem [shape: bf16[32,64], index: 3, kind: input, shape index: {}]   ;;  %s2801_s4 = inlined_call_operand.vmem [shape: f32[32,1], index: 4, kind: input, shape index: {}]   ;;  %s2802_s5 = inlined_call_operand.vmem [shape: bf16[1,32], index: 5, kind: input, shape index: {}]   ;;  %s2803_s6 = inlined_call_operand.<no memory space> [shape: f32[1,1], index: 6, kind: input, shape index: {}]   ;;  %s2804_s7 = inlined_call_operand.vmem [shape: f32[1,3072], index: 7, kind: output, shape index: {}]  }
   0x1   :  { %v12_v0 = vstv %s2803_s6 }
   0x2   :  { %13 = vst [vmem:[#allocation2] sm:$0x1] %v12_v0 }
   0x3 LB: > { %s2210_s27 = sadd.s32 4294967295, %s2363_s26   ;;  %p2214_p0 = scmp.ge.s32.totalorder %s2363_s26, 1  ;;  %s2363_s26 = sphi %s2411_s26, %s19_s26  }
   0x4   : > { %p240_p1 = scmp.lt.s32.totalorder %s2363_s26, 3 }
   0x6   : > { %p241_p2 = pnand %p2214_p0, %p240_p1 }
   0x7   : > { %s271_s28 = smul.u32 (!%p241_p2), 12, %s2210_s27  ;;  %v2365_v1 = vmov (!%p241_p2), 0   ;;  %vm384_vm0 = vcmask (!%p241_p2), 1041408   ;;  %v2425_v2 = vld [vmem:[%s2799_s2] sm:$0xff] (!%p241_p2)  ;;  %v2434_v3 = vld [vmem:[%s2799_s2 + $0x8] sm:$0xff] (!%p241_p2)  ;;  %vm385_vm1 = vcmask (!%p241_p2), 1042432  }
   0x8   : > { %244 = sbr.rel (%p241_p2) target bundleno = 1732 (0x6c4), region = 48  ;;  %432 = vmatprep.mubr.bf16.mxu0 (!%p241_p2), %v2365_v1  ;;  %505 = vmatprep.mubr.bf16.mxu1 (!%p241_p2), %v2365_v1  ;;  %v2366_v4 = vmov (!%p241_p2), 65535   ;;  %v2439_v6 = vld [vmem:[%s2799_s2 + $0x10] sm:$0xff] (!%p241_p2)  ;;  %v2452_v7 = vld [vmem:[%s2799_s2 + $0x18] sm:$0xff] (!%p241_p2)  ;;  %v2461_v11 = vld [vmem:[%s2799_s2 + $0x20] sm:$0xff] (!%p241_p2)  ;;  %vm371_vm2 = vcmask (!%p241_p2), 39936  }
   0x9   : > { %p272_p3 = scmp.lt.s32.totalorder (!%p241_p2), %s271_s28, 23  ;;  %2301 = vset.pattern.permute.xlu0 (!%p241_p2), %v2365_v1  ;;  %2302 = vset.pattern.permute.xlu1 (!%p241_p2), %v2365_v1  ;;  %v386_v5 = vsel (!%p241_p2), %vm384_vm0, 4294967295, %v2366_v4  ;;  %v299_v16 = vld [vmem:[%s2799_s2 + $0x30] sm:$0xff] (!%p241_p2)  ;;  %v298_v17 = vld [vmem:[%s2799_s2 + $0x28] sm:$0xff] (!%p241_p2)  ;;  %v2307_v22 = vld [vmem:[%s2798_s1] sm:$0xff] (!%p241_p2)   ;;  %vm632_vm3 = vcmask (!%p241_p2), 523264  }
   0xa   : > { %303 = vperm.xlu0 (!%p241_p2), %2301, %v2425_v2   ;;  %313 = vperm.xlu1 (!%p241_p2), %2302, %v2439_v6   ;;  %v2455_v9 = vsel (!%p241_p2), %vm385_vm1, %v386_v5, 0  ;;  %v598_v23 = vld [vmem:[%s2801_s4] sm:$0xff] (!%p241_p2)  ;;  %v300_v24 = vld [vmem:[%s2799_s2 + $0x38] sm:$0xff] (!%p241_p2)  ;;  %v600_v25 = vld [vmem:[%s2801_s4 + $0x10] sm:$0xff] (!%p241_p2)  ;;  %vm780_vm4 = vcmask (!%p241_p2), 261120  }
   0xb   : > { %v599_v26 = vld [vmem:[%s2801_s4 + $0x8] sm:$0xff] (!%p241_p2)  ;;  %v601_v28 = vld [vmem:[%s2801_s4 + $0x18] sm:$0xff] (!%p241_p2)  ;;  %v2309_v29 = vld [vmem:[%s2798_s1 + $0x10] sm:$0xff] (!%p241_p2)  }
   0xc   : > { %v2308_v27 = vld [vmem:[%s2798_s1 + $0x8] sm:$0xff] (!%p241_p2)   ;;  %v2310_v30 = vld [vmem:[%s2798_s1 + $0x18] sm:$0xff] (!%p241_p2)   ;;  %v770_v31 = vld [vmem:[#allocation2] sm:$0x1] (!%p241_p2) }
   0xd   : > { %v2019_v32 = vld [vmem:[#allocation2] sm:$0x1] (!%p241_p2) }
   0xe   : > { %308 = vperm.xlu0 (!%p241_p2), %2301, %v2434_v3   ;;  %318 = vperm.xlu1 (!%p241_p2), %2302, %v2452_v7   ;;  %v1397_v33 = vld [vmem:[#allocation2] sm:$0x1] (!%p241_p2) }
   0xf   : > { %s2808_s28 = smov (!%p272_p3, %s271_s28), 23 }
  0x10   : > { %s2215_s11 = sshll.u32 %s2808_s28, 2  ;;  %s2628_s15 = scalar_lea.vmem %s2804_s7, %s2808_s28 }
  0x11   : > { %s2446_s14 = scalar_lea.vmem %s2797_s0, %s2215_s11 }
  0x12   : > { %v283_v8 = vld [vmem:[%s2446_s14] sm:$0x77]  ;;  %v284_v10 = vld [vmem:[%s2446_s14 + $0x8] sm:$0x77]  ;;  %323 = vperm.xlu0 %2301, %v2461_v11   ;;  %328 = vperm.xlu1 %2302, %v298_v17  }
  0x13   : > { %v2221_v12 = vcombine.high %v283_v8, %v283_v8  ;;  %v2223_v13 = vcombine.high %v284_v10, %v284_v10  ;;  %v2220_v14 = vcombine.low %v283_v8, %v283_v8  ;;  %v2222_v15 = vcombine.low %v284_v10, %v284_v10 }
  0x15   : > { %v392_v18 = vand.u32 %v2221_v12, %v2455_v9  ;;  %v398_v19 = vand.u32 %v2223_v13, %v2455_v9  ;;  %v389_v20 = vand.u32 %v2220_v14, %v2455_v9  ;;  %v395_v21 = vand.u32 %v2222_v15, %v2455_v9 }
  0x16   : > { %333 = vperm.xlu0 %2301, %v299_v16   ;;  %338 = vperm.xlu1 %2302, %v300_v24  }
  0x17   : > { %400 = vmatprep.subr.bf16.mxu0 %v392_v18  ;;  %473 = vmatprep.subr.bf16.mxu1 %v398_v19 }
  0x18   : > { %401 = vmatpush1.bf16.msra.mxu0 %v389_v20  ;;  %474 = vmatpush1.bf16.msra.mxu1 %v395_v21 }
  0x1a   : > { %604 = vperm.xlu0 %2301, %v598_v23   ;;  %609 = vperm.xlu1 %2302, %v599_v26  }
  0x1b   : > { %2224 = vmatmul.mubr.msk.bf16.vlgmr.msra.gmra.mrb[0].mxu0 %vm371_vm2, %v2307_v22  ;;  %2228 = vmatmul.mubr.msk.bf16.vlgmr.msra.gmra.mrb[0].mxu1 %vm371_vm2, %v2307_v22 }
  0x1c   : > { %442 = vmatprep.mubr.bf16.mxu0 %v2365_v1  ;;  %515 = vmatprep.mubr.bf16.mxu1 %v2365_v1 }
  0x1e   : > { %614 = vperm.xlu0 %2301, %v600_v25   ;;  %619 = vperm.xlu1 %2302, %v601_v28  }
  0x22   : > { %936 = vperm.xlu0 %2301, %v2425_v2   ;;  %941 = vperm.xlu1 %2302, %v2434_v3  }
  0x23   : > { %2225 = vmatmul.mubr.msk.bf16.gmra.mrb[4].mxu0 %vm371_vm2, %v2308_v27  ;;  %2229 = vmatmul.mubr.msk.bf16.gmra.mrb[4].mxu1 %vm371_vm2, %v2308_v27 }
  0x24   : > { %452 = vmatprep.mubr.bf16.mxu0 %v2365_v1  ;;  %525 = vmatprep.mubr.bf16.mxu1 %v2365_v1 }
  0x26   : > { %946 = vperm.xlu0 %2301, %v2439_v6   ;;  %951 = vperm.xlu1 %2302, %v2452_v7  }
  0x2a   : > { %956 = vperm.xlu0 %2301, %v2461_v11   ;;  %961 = vperm.xlu1 %2302, %v298_v17  }
  0x2b   : > { %2226 = vmatmul.mubr.msk.bf16.gmra.mrb[8].mxu0 %vm371_vm2, %v2309_v29  ;;  %2230 = vmatmul.mubr.msk.bf16.gmra.mrb[8].mxu1 %vm371_vm2, %v2309_v29 }
  0x2c   : > { %462 = vmatprep.mubr.bf16.mxu0 %v2365_v1  ;;  %535 = vmatprep.mubr.bf16.mxu1 %v2365_v1 }
  0x2e   : > { %966 = vperm.xlu0 %2301, %v299_v16   ;;  %971 = vperm.xlu1 %2302, %v300_v24  }
  0x32   : > { %1232 = vperm.xlu0 %2301, %v598_v23   ;;  %1237 = vperm.xlu1 %2302, %v599_v26  }
  0x33   : > { %2227 = vmatmul.mubr.msk.bf16.gmra.mrb[12].mxu0 %vm371_vm2, %v2310_v30  ;;  %2231 = vmatmul.mubr.msk.bf16.gmra.mrb[12].mxu1 %vm371_vm2, %v2310_v30 }
  0x34   : > { %671 = vmatprep.mubr.bf16.mxu0 %v2365_v1  ;;  %724 = vmatprep.mubr.bf16.mxu1 %v2365_v1 }
  0x36   : > { %1242 = vperm.xlu0 %2301, %v600_v25   ;;  %1247 = vperm.xlu1 %2302, %v601_v28  }
  0x3a   : > { %1558 = vperm.xlu0 %2301, %v2425_v2   ;;  %1563 = vperm.xlu1 %2302, %v2434_v3  }
  0x3e   : > { %1568 = vperm.xlu0 %2301, %v2439_v6   ;;  %1573 = vperm.xlu1 %2302, %v2452_v7  }
  0x42   : > { %1578 = vperm.xlu0 %2301, %v2461_v11   ;;  %1583 = vperm.xlu1 %2302, %v298_v17  }
  0x46   : > { %1588 = vperm.xlu0 %2301, %v299_v16   ;;  %1593 = vperm.xlu1 %2302, %v300_v24  }
  0x4a   : > { %1854 = vperm.xlu0 %2301, %v598_v23   ;;  %1859 = vperm.xlu1 %2302, %v599_v26  }
  0x4e   : > { %1864 = vperm.xlu0 %2301, %v600_v25   ;;  %1869 = vperm.xlu1 %2302, %v601_v28  }
  0x52   : > { %773 = vperm.xlu0 %2301, %v770_v31   ;;  %1400 = vperm.xlu1 %2302, %v1397_v33  }
  0x56   : > { %2022 = vperm.xlu0 %2301, %v2019_v32  }
  0x89   : > { %v304_v34 = vpop.permute.xlu0 %303  ;;  %v314_v36 = vpop.permute.xlu1 %313 }
  0x8d   : > { %v309_v35 = vpop.permute.xlu0 %308  ;;  %v319_v61 = vpop.permute.xlu1 %318 }
  0x91   : > { %v324_v28 = vpop.permute.xlu0 %323  ;;  %v329_v29 = vpop.permute.xlu1 %328 }
  0xee   : > { %v434_v37 = vpop.f32.mrb[0].mxu0  ;;  %v507_v38 = vpop.f32.mrb[0].mxu1 }
  0xef   : > { %v435_v39 = vadd.f32 %v434_v37, %v304_v34  ;;  %v508_v40 = vadd.f32 %v507_v38, %v304_v34  ;;  %v436_v41 = vpop.f32.mrb[1].mxu0  ;;  %v509_v42 = vpop.f32.mrb[1].mxu1 }
  0xf0   : > { %v437_v43 = vadd.f32 %v436_v41, %v304_v34  ;;  %v510_v44 = vadd.f32 %v509_v42, %v304_v34  ;;  %v438_v45 = vpop.f32.mrb[2].mxu0  ;;  %v511_v46 = vpop.f32.mrb[2].mxu1 }
  0xf1   : > { %v439_v47 = vadd.f32 %v438_v45, %v309_v35  ;;  %v512_v48 = vadd.f32 %v511_v46, %v309_v35  ;;  %v440_v49 = vpop.f32.mrb[3].mxu0  ;;  %v513_v50 = vpop.f32.mrb[3].mxu1  ;;  %v546_v53 = vmax.f32 %v435_v39, 0.0  ;;  %v548_v54 = vmax.f32 %v508_v40, 0.0 }
  0xf2   : > { %v441_v51 = vadd.f32 %v440_v49, %v309_v35  ;;  %v514_v52 = vadd.f32 %v513_v50, %v309_v35  ;;  %v547_v57 = vmax.f32 %v437_v43, 0.0  ;;  %v549_v58 = vmax.f32 %v510_v44, 0.0 }
  0xf3   : > { %v550_v55 = vmax.f32 %v439_v47, 0.0  ;;  %v552_v56 = vmax.f32 %v512_v48, 0.0 }
  0xf4   : > { %v551_v59 = vmax.f32 %v441_v51, 0.0  ;;  %v553_v60 = vmax.f32 %v514_v52, 0.0 }
  0xf5   : > { %v578_v62 = vpack.c.bf16 %v550_v55, %v546_v53  ;;  %v580_v63 = vpack.c.bf16 %v552_v56, %v548_v54 }
  0xf6   : > { %v579_v0 = vpack.c.bf16 %v551_v59, %v547_v57  ;;  %v581_v2 = vpack.c.bf16 %v553_v60, %v549_v58  ;;  %v444_v3 = vpop.f32.mrb[4].mxu0  ;;  %v517_v4 = vpop.f32.mrb[4].mxu1 }
  0xf7   : > { %v445_v5 = vadd.f32 %v444_v3, %v314_v36  ;;  %v518_v6 = vadd.f32 %v517_v4, %v314_v36  ;;  %v446_v7 = vpop.f32.mrb[5].mxu0  ;;  %v519_v8 = vpop.f32.mrb[5].mxu1 }
  0xf8   : > { %v447_v10 = vadd.f32 %v446_v7, %v314_v36  ;;  %v520_v11 = vadd.f32 %v519_v8, %v314_v36  ;;  %v448_v12 = vpop.f32.mrb[6].mxu0  ;;  %v521_v13 = vpop.f32.mrb[6].mxu1  ;;  %639 = vmatprep.subr.bf16.mxu0 %v579_v0  ;;  %692 = vmatprep.subr.bf16.mxu1 %v581_v2 }
  0xf9   : > { %v449_v14 = vadd.f32 %v448_v12, %v319_v61  ;;  %v522_v15 = vadd.f32 %v521_v13, %v319_v61  ;;  %v450_v16 = vpop.f32.mrb[7].mxu0  ;;  %v523_v17 = vpop.f32.mrb[7].mxu1  ;;  %640 = vmatpush1.bf16.msra.mxu0 %v578_v62  ;;  %693 = vmatpush1.bf16.msra.mxu1 %v580_v63  ;;  %v554_v20 = vmax.f32 %v445_v5, 0.0  ;;  %v556_v21 = vmax.f32 %v518_v6, 0.0 }
  0xfa   : > { %v451_v18 = vadd.f32 %v450_v16, %v319_v61  ;;  %v524_v19 = vadd.f32 %v523_v17, %v319_v61  ;;  %v555_v24 = vmax.f32 %v447_v10, 0.0  ;;  %v557_v25 = vmax.f32 %v520_v11, 0.0  ;;  %v334_v58 = vpop.permute.xlu0 %333  ;;  %v339_v59 = vpop.permute.xlu1 %338 }
  0xfb   : > { %v558_v22 = vmax.f32 %v449_v14, 0.0  ;;  %v560_v23 = vmax.f32 %v522_v15, 0.0 }
  0xfc   : > { %v559_v26 = vmax.f32 %v451_v18, 0.0  ;;  %v561_v27 = vmax.f32 %v524_v19, 0.0 }
  0xfd   : > { %v582_v30 = vpack.c.bf16 %v558_v22, %v554_v20  ;;  %v584_v31 = vpack.c.bf16 %v560_v23, %v556_v21 }
  0xfe   : > { %v583_v32 = vpack.c.bf16 %v559_v26, %v555_v24  ;;  %v585_v33 = vpack.c.bf16 %v561_v27, %v557_v25  ;;  %v454_v34 = vpop.f32.mrb[8].mxu0  ;;  %v527_v35 = vpop.f32.mrb[8].mxu1 }
  0xff   : > { %v455_v36 = vadd.f32 %v454_v34, %v324_v28  ;;  %v528_v37 = vadd.f32 %v527_v35, %v324_v28  ;;  %v456_v38 = vpop.f32.mrb[9].mxu0  ;;  %v529_v39 = vpop.f32.mrb[9].mxu1 }
 0x100   : > { %v457_v40 = vadd.f32 %v456_v38, %v324_v28  ;;  %v530_v41 = vadd.f32 %v529_v39, %v324_v28  ;;  %v458_v42 = vpop.f32.mrb[10].mxu0  ;;  %v531_v43 = vpop.f32.mrb[10].mxu1  ;;  %641 = vmatprep.subr.bf16.mxu0 %v583_v32  ;;  %694 = vmatprep.subr.bf16.mxu1 %v585_v33 }
 0x101   : > { %v459_v44 = vadd.f32 %v458_v42, %v329_v29  ;;  %v532_v45 = vadd.f32 %v531_v43, %v329_v29  ;;  %v460_v46 = vpop.f32.mrb[11].mxu0  ;;  %v533_v47 = vpop.f32.mrb[11].mxu1  ;;  %642 = vmatpush1.bf16.msra.mxu0 %v582_v30  ;;  %695 = vmatpush1.bf16.msra.mxu1 %v584_v31  ;;  %v562_v50 = vmax.f32 %v455_v36, 0.0  ;;  %v564_v51 = vmax.f32 %v528_v37, 0.0  ;;  %v2311_v30 = vld [vmem:[%s2800_s3] sm:$0xff]   ;;  %v2312_v31 = vld [vmem:[%s2800_s3 + $0x8] sm:$0xff]  }
 0x102   : > { %v461_v48 = vadd.f32 %v460_v46, %v329_v29  ;;  %v534_v49 = vadd.f32 %v533_v47, %v329_v29  ;;  %v563_v54 = vmax.f32 %v457_v40, 0.0  ;;  %v565_v55 = vmax.f32 %v530_v41, 0.0  ;;  %v605_v32 = vpop.permute.xlu0 %604  ;;  %v610_v33 = vpop.permute.xlu1 %609 }
 0x103   : > { %v566_v52 = vmax.f32 %v459_v44, 0.0  ;;  %v568_v53 = vmax.f32 %v532_v45, 0.0 }
 0x104   : > { %v567_v56 = vmax.f32 %v461_v48, 0.0  ;;  %v569_v57 = vmax.f32 %v534_v49, 0.0 }
 0x105   : > { %v586_v60 = vpack.c.bf16 %v566_v52, %v562_v50  ;;  %v588_v61 = vpack.c.bf16 %v568_v53, %v564_v51 }
 0x106   : > { %v587_v62 = vpack.c.bf16 %v567_v56, %v563_v54  ;;  %v589_v63 = vpack.c.bf16 %v569_v57, %v565_v55  ;;  %v464_v0 = vpop.f32.mrb[12].mxu0  ;;  %v537_v2 = vpop.f32.mrb[12].mxu1 }
 0x107   : > { %v465_v3 = vadd.f32 %v464_v0, %v334_v58  ;;  %v538_v4 = vadd.f32 %v537_v2, %v334_v58  ;;  %v466_v5 = vpop.f32.mrb[13].mxu0  ;;  %v539_v6 = vpop.f32.mrb[13].mxu1 }
 0x108   : > { %v467_v7 = vadd.f32 %v466_v5, %v334_v58  ;;  %v540_v8 = vadd.f32 %v539_v6, %v334_v58  ;;  %v468_v10 = vpop.f32.mrb[14].mxu0  ;;  %v541_v11 = vpop.f32.mrb[14].mxu1  ;;  %643 = vmatprep.subr.bf16.mxu0 %v587_v62  ;;  %696 = vmatprep.subr.bf16.mxu1 %v589_v63 }
 0x109   : > { %v469_v12 = vadd.f32 %v468_v10, %v339_v59  ;;  %v542_v13 = vadd.f32 %v541_v11, %v339_v59  ;;  %v470_v14 = vpop.f32.mrb[15].mxu0  ;;  %v543_v15 = vpop.f32.mrb[15].mxu1  ;;  %644 = vmatpush1.bf16.msra.mxu0 %v586_v60  ;;  %697 = vmatpush1.bf16.msra.mxu1 %v588_v61  ;;  %v570_v18 = vmax.f32 %v465_v3, 0.0  ;;  %v572_v19 = vmax.f32 %v538_v4, 0.0 }
 0x10a   : > { %v471_v16 = vadd.f32 %v470_v14, %v339_v59  ;;  %v544_v17 = vadd.f32 %v543_v15, %v339_v59  ;;  %v571_v22 = vmax.f32 %v467_v7, 0.0  ;;  %v573_v23 = vmax.f32 %v540_v8, 0.0  ;;  %v615_v58 = vpop.permute.xlu0 %614  ;;  %v620_v59 = vpop.permute.xlu1 %619  ;;  %v916_v7 = vld [vmem:[%s2446_s14 + $0x10] sm:$0x77]  ;;  %v917_v8 = vld [vmem:[%s2446_s14 + $0x18] sm:$0x77] }
 0x10b   : > { %v574_v20 = vmax.f32 %v469_v12, 0.0  ;;  %v576_v21 = vmax.f32 %v542_v13, 0.0 }
 0x10c   : > { %v575_v24 = vmax.f32 %v471_v16, 0.0  ;;  %v577_v25 = vmax.f32 %v544_v17, 0.0 }
 0x10d   : > { %v590_v26 = vpack.c.bf16 %v574_v20, %v570_v18  ;;  %v592_v27 = vpack.c.bf16 %v576_v21, %v572_v19  ;;  %v2245_v20 = vcombine.high %v916_v7, %v916_v7  ;;  %v2247_v21 = vcombine.high %v917_v8, %v917_v8 }
 0x10e   : > { %v591_v28 = vpack.c.bf16 %v575_v24, %v571_v22  ;;  %v593_v29 = vpack.c.bf16 %v577_v25, %v573_v23 }
 0x110   : > { %645 = vmatprep.subr.bf16.mxu0 %v591_v28  ;;  %698 = vmatprep.subr.bf16.mxu1 %v593_v29 }
 0x111   : > { %646 = vmatpush1.bf16.msra.mxu0 %v590_v26  ;;  %699 = vmatpush1.bf16.msra.mxu1 %v592_v27 }
 0x114   : > { %2234 = vmatmul.mubr.msk.bf16.vlgmr.msra.gmra.mrb[16].mxu0 %vm632_vm3, %v2311_v30  ;;  %2236 = vmatmul.mubr.msk.bf16.vlgmr.msra.gmra.mrb[16].mxu1 %vm632_vm3, %v2311_v30 }
 0x115   : > { %681 = vmatprep.mubr.bf16.mxu0 %v2365_v1  ;;  %734 = vmatprep.mubr.bf16.mxu1 %v2365_v1 }
 0x11c   : > { %2235 = vmatmul.mubr.msk.bf16.gmra.mrb[20].mxu0 %vm632_vm3, %v2312_v31  ;;  %2237 = vmatmul.mubr.msk.bf16.gmra.mrb[20].mxu1 %vm632_vm3, %v2312_v31 }
 0x11d   : > { %816 = vmatprep.mubr.bf16.mxu0 %v2365_v1  ;;  %857 = vmatprep.mubr.bf16.mxu1 %v2365_v1 }
 0x1e7   : > { %v673_v34 = vpop.f32.mrb[16].mxu0  ;;  %v726_v35 = vpop.f32.mrb[16].mxu1 }
 0x1e8   : > { %v674_v36 = vadd.f32 %v673_v34, %v605_v32  ;;  %v727_v37 = vadd.f32 %v726_v35, %v605_v32  ;;  %v675_v38 = vpop.f32.mrb[17].mxu0  ;;  %v728_v39 = vpop.f32.mrb[17].mxu1 }
 0x1e9   : > { %v676_v40 = vadd.f32 %v675_v38, %v605_v32  ;;  %v729_v41 = vadd.f32 %v728_v39, %v605_v32  ;;  %v677_v42 = vpop.f32.mrb[18].mxu0  ;;  %v730_v43 = vpop.f32.mrb[18].mxu1  ;;  %v2244_v32 = vcombine.low %v916_v7, %v916_v7  ;;  %v769_v38 = vld [vmem:[%s2802_s5] sm:$0x1] }
 0x1ea   : > { %v678_v44 = vadd.f32 %v677_v42, %v610_v33  ;;  %v731_v45 = vadd.f32 %v730_v43, %v610_v33  ;;  %v679_v46 = vpop.f32.mrb[19].mxu0  ;;  %v732_v47 = vpop.f32.mrb[19].mxu1  ;;  %v745_v50 = vmax.f32 %v674_v36, 0.0  ;;  %v747_v51 = vmax.f32 %v727_v37, 0.0  ;;  %v2318_v42 = vld [vmem:[%s2798_s1 + $0x8] sm:$0xff]   ;;  %v2319_v43 = vld [vmem:[%s2798_s1 + $0x10] sm:$0xff]  }
 0x1eb   : > { %v680_v48 = vadd.f32 %v679_v46, %v610_v33  ;;  %v733_v49 = vadd.f32 %v732_v47, %v610_v33  ;;  %v746_v54 = vmax.f32 %v676_v40, 0.0  ;;  %v748_v55 = vmax.f32 %v729_v41, 0.0  ;;  %v2317_v41 = vld [vmem:[%s2798_s1] sm:$0xff]  }
 0x1ec   : > { %v749_v52 = vmax.f32 %v678_v44, 0.0  ;;  %v751_v53 = vmax.f32 %v731_v45, 0.0  ;;  %v2246_v33 = vcombine.low %v917_v8, %v917_v8  ;;  %v1020_v36 = vand.u32 %v2245_v20, %v2455_v9  ;;  %v2320_v44 = vld [vmem:[%s2798_s1 + $0x18] sm:$0xff]   ;;  %v937_v45 = vpop.permute.xlu0 %936 }
 0x1ed   : > { %v750_v56 = vmax.f32 %v680_v48, 0.0  ;;  %v752_v57 = vmax.f32 %v733_v49, 0.0  ;;  %v1026_v37 = vand.u32 %v2247_v21, %v2455_v9  ;;  %v1017_v39 = vand.u32 %v2244_v32, %v2455_v9 }
 0x1ee   : > { %v761_v60 = vpack.c.bf16 %v749_v52, %v745_v50  ;;  %v763_v61 = vpack.c.bf16 %v751_v53, %v747_v51  ;;  %v1023_v40 = vand.u32 %v2246_v33, %v2455_v9 }
 0x1ef   : > { %v762_v62 = vpack.c.bf16 %v750_v56, %v746_v54  ;;  %v764_v63 = vpack.c.bf16 %v752_v57, %v748_v55  ;;  %v683_v0 = vpop.f32.mrb[20].mxu0  ;;  %v736_v2 = vpop.f32.mrb[20].mxu1  ;;  %v776_v56 = vlaneseq }
 0x1f0   : > { %v684_v3 = vadd.f32 %v683_v0, %v615_v58  ;;  %v737_v4 = vadd.f32 %v736_v2, %v615_v58  ;;  %v685_v5 = vpop.f32.mrb[21].mxu0  ;;  %v738_v6 = vpop.f32.mrb[21].mxu1 }
 0x1f1   : > { %v686_v10 = vadd.f32 %v685_v5, %v615_v58  ;;  %v739_v11 = vadd.f32 %v738_v6, %v615_v58  ;;  %v687_v12 = vpop.f32.mrb[22].mxu0  ;;  %v740_v13 = vpop.f32.mrb[22].mxu1  ;;  %784 = vmatprep.subr.bf16.mxu0 %v762_v62  ;;  %825 = vmatprep.subr.bf16.mxu1 %v764_v63  ;;  %v2604_v57 = vshrl.u32 %v776_v56, 7  ;;  %vm2631_vm5 = vcmp.lt.s32.totalorder %v776_v56, 512 }
 0x1f2   : > { %v688_v14 = vadd.f32 %v687_v12, %v620_v59  ;;  %v741_v15 = vadd.f32 %v740_v13, %v620_v59  ;;  %v689_v16 = vpop.f32.mrb[23].mxu0  ;;  %v742_v17 = vpop.f32.mrb[23].mxu1  ;;  %785 = vmatpush1.bf16.msra.mxu0 %v761_v60  ;;  %826 = vmatpush1.bf16.msra.mxu1 %v763_v61  ;;  %v753_v22 = vmax.f32 %v684_v3, 0.0  ;;  %v755_v23 = vmax.f32 %v737_v4, 0.0 }
 0x1f3   : > { %v690_v18 = vadd.f32 %v689_v16, %v620_v59  ;;  %v743_v19 = vadd.f32 %v742_v17, %v620_v59  ;;  %v754_v26 = vmax.f32 %v686_v10, 0.0  ;;  %v756_v27 = vmax.f32 %v739_v11, 0.0  ;;  %v2583_v46 = vpop.permute.xlu0 %946  ;;  %v942_v16 = vpop.permute.xlu1 %941 }
 0x1f4   : > { %v757_v24 = vmax.f32 %v688_v14, 0.0  ;;  %v759_v25 = vmax.f32 %v741_v15, 0.0  ;;  %v2609_v59 = vsub.s32 0, %v2604_v57 }
 0x1f5   : > { %v758_v28 = vmax.f32 %v690_v18, 0.0  ;;  %v760_v29 = vmax.f32 %v743_v19, 0.0 }
 0x1f6   : > { %v765_v30 = vpack.c.bf16 %v757_v24, %v753_v22  ;;  %v767_v31 = vpack.c.bf16 %v759_v25, %v755_v23 }
 0x1f7   : > { %v766_v34 = vpack.c.bf16 %v758_v28, %v754_v26  ;;  %v768_v35 = vpack.c.bf16 %v760_v29, %v756_v27  ;;  %v2585_v47 = vpop.permute.xlu0 %956  ;;  %v2367_v27 = vmov 1966171168  }
 0x1f8   : > { %v889_v28 = vunpack.c.l.s4 %v2367_v27 }
 0x1f9   : > { %786 = vmatprep.subr.bf16.mxu0 %v766_v34  ;;  %827 = vmatprep.subr.bf16.mxu1 %v768_v35 }
 0x1fa   : > { %787 = vmatpush1.bf16.msra.mxu0 %v765_v30  ;;  %828 = vmatpush1.bf16.msra.mxu1 %v767_v31 }
 0x1fb   : > { %1028 = vmatprep.subr.bf16.mxu0 %v1020_v36  ;;  %1101 = vmatprep.subr.bf16.mxu1 %v1026_v37  ;;  %v2587_v48 = vpop.permute.xlu0 %966 }
 0x1fd   : > { %2238 = vmatmul.mubr.msk.bf16.vlgmr.msra.gmra.mrb[24].mxu0 %vm780_vm4, %v769_v38  ;;  %2239 = vmatmul.mubr.msk.bf16.vlgmr.msra.gmra.mrb[24].mxu1 %vm780_vm4, %v769_v38 }
 0x1fe   : > { %1029 = vmatpush1.bf16.msra.mxu0 %v1017_v39  ;;  %1102 = vmatpush1.bf16.msra.mxu1 %v1023_v40 }
 0x1ff   : > { %1060 = vmatprep.mubr.bf16.mxu0 %v2365_v1  ;;  %1133 = vmatprep.mubr.bf16.mxu1 %v2365_v1  ;;  %v2589_v49 = vpop.permute.xlu0 %1232 }
 0x203   : > { %v2591_v50 = vpop.permute.xlu0 %1242 }
 0x205   : > { %2248 = vmatmul.mubr.msk.bf16.vlgmr.msra.gmra.mrb[28].mxu0 %vm371_vm2, %v2317_v41  ;;  %2252 = vmatmul.mubr.msk.bf16.vlgmr.msra.gmra.mrb[28].mxu1 %vm371_vm2, %v2317_v41 }
 0x206   : > { %1070 = vmatprep.mubr.bf16.mxu0 %v2365_v1  ;;  %1143 = vmatprep.mubr.bf16.mxu1 %v2365_v1 }
 0x207   : > { %v2593_v51 = vpop.permute.xlu0 %1558 }
 0x20b   : > { %v2595_v52 = vpop.permute.xlu0 %1568 }
 0x20d   : > { %2249 = vmatmul.mubr.msk.bf16.gmra.mrb[32].mxu0 %vm371_vm2, %v2318_v42  ;;  %2253 = vmatmul.mubr.msk.bf16.gmra.mrb[32].mxu1 %vm371_vm2, %v2318_v42 }
 0x20e   : > { %1080 = vmatprep.mubr.bf16.mxu0 %v2365_v1  ;;  %1153 = vmatprep.mubr.bf16.mxu1 %v2365_v1 }
 0x20f   : > { %v2597_v53 = vpop.permute.xlu0 %1578 }
 0x213   : > { %v2599_v54 = vpop.permute.xlu0 %1588 }
 0x215   : > { %2250 = vmatmul.mubr.msk.bf16.gmra.mrb[36].mxu0 %vm371_vm2, %v2319_v43  ;;  %2254 = vmatmul.mubr.msk.bf16.gmra.mrb[36].mxu1 %vm371_vm2, %v2319_v43 }
 0x216   : > { %1090 = vmatprep.mubr.bf16.mxu0 %v2365_v1  ;;  %1163 = vmatprep.mubr.bf16.mxu1 %v2365_v1 }
 0x217   : > { %v2601_v55 = vpop.permute.xlu0 %1854 }
 0x21b   : > { %v2606_v58 = vpop.permute.xlu0 %1864 }
 0x21d   : > { %2251 = vmatmul.mubr.msk.bf16.gmra.mrb[40].mxu0 %vm371_vm2, %v2320_v44  ;;  %2255 = vmatmul.mubr.msk.bf16.gmra.mrb[40].mxu1 %vm371_vm2, %v2320_v44  ;;  %v952_v44 = vpop.permute.xlu1 %951 }
 0x21e   : > { %1298 = vmatprep.mubr.bf16.mxu0 %v2365_v1  ;;  %1351 = vmatprep.mubr.bf16.mxu1 %v2365_v1 }
 0x21f   : > { %v774_v60 = vpop.permute.xlu0 %773 }
 0x220   : > { %v779_v61 = vrot.slane %v774_v60, %v2609_v59 }
 0x2d0   : > { %v818_v62 = vpop.f32.mrb[24].mxu0  ;;  %v859_v63 = vpop.f32.mrb[24].mxu1 }
 0x2d1   : > { %v819_v0 = vadd.f32 %v818_v62, %v779_v61  ;;  %v860_v2 = vadd.f32 %v859_v63, %v779_v61  ;;  %v820_v3 = vpop.f32.mrb[25].mxu0  ;;  %v861_v4 = vpop.f32.mrb[25].mxu1 }
 0x2d2   : > { %v821_v5 = vadd.f32 %v820_v3, %v779_v61  ;;  %v862_v6 = vadd.f32 %v861_v4, %v779_v61  ;;  %v822_v7 = vpop.f32.mrb[26].mxu0  ;;  %v863_v8 = vpop.f32.mrb[26].mxu1 }
 0x2d3   : > { %v866_v10 = vmul.f32 0.5, %v819_v0  ;;  %v868_v11 = vmul.f32 0.5, %v860_v2  ;;  %v823_v12 = vpop.f32.mrb[27].mxu0  ;;  %v864_v13 = vpop.f32.mrb[27].mxu1 }
 0x2d4   : > { %v867_v14 = vmul.f32 0.5, %v821_v5  ;;  %v869_v15 = vmul.f32 0.5, %v862_v6 }
 0x2d5   : > { %2333 = vtanh.f32 %v866_v10 }
 0x2d6   : > { %2335 = vtanh.f32 %v868_v11 }
 0x2d7   : > { %2337 = vtanh.f32 %v867_v14 }
 0x2d8   : > { %2339 = vtanh.f32 %v869_v15  ;;  %v1062_v17 = vpop.f32.mrb[28].mxu0  ;;  %v1135_v18 = vpop.f32.mrb[28].mxu1 }
 0x2d9   : > { %v1063_v19 = vadd.f32 %v1062_v17, %v937_v45  ;;  %v1136_v20 = vadd.f32 %v1135_v18, %v937_v45  ;;  %v1064_v21 = vpop.f32.mrb[29].mxu0  ;;  %v1137_v22 = vpop.f32.mrb[29].mxu1 }
 0x2da   : > { %v1065_v23 = vadd.f32 %v1064_v21, %v937_v45  ;;  %v1138_v24 = vadd.f32 %v1137_v22, %v937_v45  ;;  %v1066_v25 = vpop.f32.mrb[30].mxu0  ;;  %v1139_v26 = vpop.f32.mrb[30].mxu1  ;;  %v890_v45 = vunpack.c.0.s8 %v889_v28 }
 0x2db   : > { %v1067_v29 = vadd.f32 %v1066_v25, %v942_v16  ;;  %v1140_v30 = vadd.f32 %v1139_v26, %v942_v16  ;;  %v1068_v31 = vpop.f32.mrb[31].mxu0  ;;  %v1141_v32 = vpop.f32.mrb[31].mxu1  ;;  %v1174_v35 = vmax.f32 %v1063_v19, 0.0  ;;  %v1176_v36 = vmax.f32 %v1136_v20, 0.0 }
 0x2dc   : > { %v1069_v33 = vadd.f32 %v1068_v31, %v942_v16  ;;  %v1142_v34 = vadd.f32 %v1141_v32, %v942_v16  ;;  %v1175_v39 = vmax.f32 %v1065_v23, 0.0  ;;  %v1177_v40 = vmax.f32 %v1138_v24, 0.0 }
 0x2dd   : > { %v1178_v37 = vmax.f32 %v1067_v29, 0.0  ;;  %v1180_v38 = vmax.f32 %v1140_v30, 0.0  ;;  %v2617_v19 = vsub.s32 %v890_v45, %v2604_v57  ;;  %v962_v57 = vpop.permute.xlu1 %961 }
 0x2de   : > { %v1179_v41 = vmax.f32 %v1069_v33, 0.0  ;;  %v1181_v42 = vmax.f32 %v1142_v34, 0.0 }
 0x2df   : > { %v2334_v43 = vpop.eup %2333  ;;  %v1206_v60 = vpack.c.bf16 %v1178_v37, %v1174_v35  ;;  %v1208_v61 = vpack.c.bf16 %v1180_v38, %v1176_v36 }
 0x2e0   : > { %v2336_v62 = vpop.eup %2335  ;;  %v874_v63 = vadd.f32 1.0, %v2334_v43  ;;  %v1207_v0 = vpack.c.bf16 %v1179_v41, %v1175_v39  ;;  %v1209_v2 = vpack.c.bf16 %v1181_v42, %v1177_v40  ;;  %v1072_v3 = vpop.f32.mrb[32].mxu0 }
 0x2e1   : > { %v1145_v4 = vpop.f32.mrb[32].mxu1  ;;  %v2338_v5 = vpop.eup %2337  ;;  %v876_v6 = vadd.f32 1.0, %v2336_v62  ;;  %v1073_v7 = vadd.f32 %v1072_v3, %v2583_v46 }
 0x2e2   : > { %v1146_v8 = vadd.f32 %v1145_v4, %v2583_v46  ;;  %v1074_v10 = vpop.f32.mrb[33].mxu0  ;;  %v1147_v11 = vpop.f32.mrb[33].mxu1  ;;  %v878_v13 = vmul.f32 0.5, %v874_v63  ;;  %v875_v14 = vadd.f32 1.0, %v2338_v5  ;;  %1266 = vmatprep.subr.bf16.mxu0 %v1207_v0  ;;  %1319 = vmatprep.subr.bf16.mxu1 %v1209_v2 }
 0x2e3   : > { %v2340_v12 = vpop.eup %2339  ;;  %v1075_v15 = vadd.f32 %v1074_v10, %v2583_v46  ;;  %v1148_v16 = vadd.f32 %v1147_v11, %v2583_v46  ;;  %v1076_v17 = vpop.f32.mrb[34].mxu0  ;;  %v880_v20 = vmul.f32 0.5, %v876_v6  ;;  %1267 = vmatpush1.bf16.msra.mxu0 %v1206_v60  ;;  %1320 = vmatpush1.bf16.msra.mxu1 %v1208_v61  ;;  %v1182_v25 = vmax.f32 %v1073_v7, 0.0 }
 0x2e4   : > { %v1149_v18 = vpop.f32.mrb[34].mxu1  ;;  %v877_v21 = vadd.f32 1.0, %v2340_v12  ;;  %v1078_v22 = vpop.f32.mrb[35].mxu0  ;;  %v879_v24 = vmul.f32 0.5, %v875_v14  ;;  %v1184_v26 = vmax.f32 %v1146_v8, 0.0  ;;  %v1077_v27 = vadd.f32 %v1076_v17, %v952_v44 }
 0x2e5   : > { %v1151_v23 = vpop.f32.mrb[35].mxu1  ;;  %v1150_v29 = vadd.f32 %v1149_v18, %v952_v44  ;;  %v1079_v46 = vadd.f32 %v1078_v22, %v952_v44  ;;  %v1183_v32 = vmax.f32 %v1075_v15, 0.0  ;;  %v1185_v33 = vmax.f32 %v1148_v16, 0.0 }
 0x2e6   : > { %v881_v28 = vmul.f32 0.5, %v877_v21  ;;  %v1152_v30 = vadd.f32 %v1151_v23, %v952_v44  ;;  %v886_v31 = vcombine.low %v878_v13, %v879_v24  ;;  %v1186_v34 = vmax.f32 %v1077_v27, 0.0  ;;  %v972_v21 = vpop.permute.xlu1 %971 }
 0x2e7   : > { %v1188_v36 = vmax.f32 %v1150_v29, 0.0  ;;  %v1187_v37 = vmax.f32 %v1079_v46, 0.0 }
 0x2e8   : > { %v887_v35 = vcombine.low %v880_v20, %v881_v28  ;;  %v1189_v38 = vmax.f32 %v1152_v30, 0.0  ;;  %v894_v39 = vrot.slane %v886_v31, %v2617_v19  ;;  %v1210_v40 = vpack.c.bf16 %v1186_v34, %v1182_v25  ;;  %v1082_v41 = vpop.f32.mrb[36].mxu0  ;;  %v1155_v42 = vpop.f32.mrb[36].mxu1 }
 0x2e9   : > { %v1212_v45 = vpack.c.bf16 %v1188_v36, %v1184_v26  ;;  %v1211_v60 = vpack.c.bf16 %v1187_v37, %v1183_v32  ;;  %v1084_v61 = vpop.f32.mrb[37].mxu0  ;;  %v1157_v62 = vpop.f32.mrb[37].mxu1  ;;  %v1083_v63 = vadd.f32 %v1082_v41, %v2585_v47  ;;  %v1156_v0 = vadd.f32 %v1155_v42, %v2585_v47 }
 0x2ea   : > { %v901_v43 = vrot.slane %v887_v35, %v2617_v19  ;;  %v1213_v44 = vpack.c.bf16 %v1189_v38, %v1185_v33  ;;  %v1085_v2 = vadd.f32 %v1084_v61, %v2585_v47  ;;  %v1086_v3 = vpop.f32.mrb[38].mxu0  ;;  %v1159_v4 = vpop.f32.mrb[38].mxu1  ;;  %v1158_v14 = vadd.f32 %v1157_v62, %v2585_v47 }
 0x2eb   : > { %v1087_v6 = vadd.f32 %v1086_v3, %v962_v57  ;;  %v1160_v7 = vadd.f32 %v1159_v4, %v962_v57  ;;  %1268 = vmatprep.subr.bf16.mxu0 %v1211_v60  ;;  %v1088_v8 = vpop.f32.mrb[39].mxu0  ;;  %v1161_v10 = vpop.f32.mrb[39].mxu1  ;;  %v1190_v12 = vmax.f32 %v1083_v63, 0.0  ;;  %v1192_v13 = vmax.f32 %v1156_v0, 0.0  ;;  %v2321_v4 = vld [vmem:[%s2800_s3] sm:$0xff]  }
 0x2ec   : > { %v902_v5 = vcombine.low %v894_v39, %v901_v43  ;;  %1321 = vmatprep.subr.bf16.mxu1 %v1213_v44  ;;  %1269 = vmatpush1.bf16.msra.mxu0 %v1210_v40  ;;  %v1089_v18 = vadd.f32 %v1088_v8, %v962_v57  ;;  %v1162_v20 = vadd.f32 %v1161_v10, %v962_v57  ;;  %v1191_v56 = vmax.f32 %v1085_v2, 0.0 }
 0x2ed   : > { %1322 = vmatpush1.bf16.msra.mxu1 %v1212_v45  ;;  %v1194_v16 = vmax.f32 %v1087_v6, 0.0  ;;  %v1196_v17 = vmax.f32 %v1160_v7, 0.0  ;;  %v1193_v25 = vmax.f32 %v1158_v14, 0.0  ;;  %v1238_v6 = vpop.permute.xlu1 %1237 }
 0x2ee   : > { %v909_v15 = vrot.slane %v902_v5, %v2617_v19  ;;  %v1195_v24 = vmax.f32 %v1089_v18, 0.0  ;;  %v1197_v26 = vmax.f32 %v1162_v20, 0.0  ;;  %v2322_v5 = vld [vmem:[%s2800_s3 + $0x8] sm:$0xff]  }
 0x2ef   : > { %v1214_v22 = vpack.c.bf16 %v1194_v16, %v1190_v12  ;;  %v1216_v23 = vpack.c.bf16 %v1196_v17, %v1192_v13 }
 0x2f0   : > { %915 = vst.msk [vmem:[%s2628_s15] sm:$0xf] %vm2631_vm5, %v909_v15  ;;  %v1092_v27 = vpop.f32.mrb[40].mxu0  ;;  %v1165_v47 = vpop.f32.mrb[40].mxu1  ;;  %v1215_v28 = vpack.c.bf16 %v1195_v24, %v1191_v56  ;;  %v1217_v32 = vpack.c.bf16 %v1197_v26, %v1193_v25 }
 0x2f1   : > { %v1093_v29 = vadd.f32 %v1092_v27, %v2587_v48  ;;  %v1166_v46 = vadd.f32 %v1165_v47, %v2587_v48  ;;  %v1094_v30 = vpop.f32.mrb[41].mxu0  ;;  %v1167_v31 = vpop.f32.mrb[41].mxu1 }
 0x2f2   : > { %v1095_v33 = vadd.f32 %v1094_v30, %v2587_v48  ;;  %v1168_v34 = vadd.f32 %v1167_v31, %v2587_v48  ;;  %v1096_v57 = vpop.f32.mrb[42].mxu0  ;;  %v1169_v35 = vpop.f32.mrb[42].mxu1  ;;  %1270 = vmatprep.subr.bf16.mxu0 %v1215_v28  ;;  %1323 = vmatprep.subr.bf16.mxu1 %v1217_v32 }
 0x2f3   : > { %v1097_v36 = vadd.f32 %v1096_v57, %v972_v21  ;;  %v1170_v37 = vadd.f32 %v1169_v35, %v972_v21  ;;  %v1098_v38 = vpop.f32.mrb[43].mxu0  ;;  %v1171_v39 = vpop.f32.mrb[43].mxu1  ;;  %1271 = vmatpush1.bf16.msra.mxu0 %v1214_v22  ;;  %v1198_v42 = vmax.f32 %v1093_v29, 0.0  ;;  %v1200_v43 = vmax.f32 %v1166_v46, 0.0  ;;  %1324 = vmatpush1.bf16.msra.mxu1 %v1216_v23 }
 0x2f4   : > { %v1099_v40 = vadd.f32 %v1098_v38, %v972_v21  ;;  %v1172_v41 = vadd.f32 %v1171_v39, %v972_v21  ;;  %v1199_v44 = vmax.f32 %v1095_v33, 0.0  ;;  %v1201_v61 = vmax.f32 %v1168_v34, 0.0  ;;  %v1248_v31 = vpop.permute.xlu1 %1247 }
 0x2f5   : > { %v1202_v45 = vmax.f32 %v1097_v36, 0.0  ;;  %v1204_v60 = vmax.f32 %v1170_v37, 0.0 }
 0x2f6   : > { %v1203_v62 = vmax.f32 %v1099_v40, 0.0  ;;  %v1205_v48 = vmax.f32 %v1172_v41, 0.0  ;;  %v1538_v40 = vld [vmem:[%s2446_s14 + $0x20] sm:$0x77]  ;;  %v1539_v41 = vld [vmem:[%s2446_s14 + $0x28] sm:$0x77] }
 0x2f7   : > { %v1218_v63 = vpack.c.bf16 %v1202_v45, %v1198_v42  ;;  %v1220_v0 = vpack.c.bf16 %v1204_v60, %v1200_v43 }
 0x2f8   : > { %v1219_v2 = vpack.c.bf16 %v1203_v62, %v1199_v44  ;;  %v1221_v3 = vpack.c.bf16 %v1205_v48, %v1201_v61 }
 0x2fa   : > { %1272 = vmatprep.subr.bf16.mxu0 %v1219_v2  ;;  %1325 = vmatprep.subr.bf16.mxu1 %v1221_v3  ;;  %v2269_v2 = vcombine.high %v1538_v40, %v1538_v40  ;;  %v2271_v3 = vcombine.high %v1539_v41, %v1539_v41 }
 0x2fb   : > { %1273 = vmatpush1.bf16.msra.mxu0 %v1218_v63  ;;  %1326 = vmatpush1.bf16.msra.mxu1 %v1220_v0 }
 0x2fe   : > { %2258 = vmatmul.mubr.msk.bf16.vlgmr.msra.gmra.mrb[44].mxu0 %vm632_vm3, %v2321_v4  ;;  %2260 = vmatmul.mubr.msk.bf16.vlgmr.msra.gmra.mrb[44].mxu1 %vm632_vm3, %v2321_v4 }
 0x2ff   : > { %1308 = vmatprep.mubr.bf16.mxu0 %v2365_v1  ;;  %1361 = vmatprep.mubr.bf16.mxu1 %v2365_v1 }
 0x306   : > { %2259 = vmatmul.mubr.msk.bf16.gmra.mrb[48].mxu0 %vm632_vm3, %v2322_v5  ;;  %2261 = vmatmul.mubr.msk.bf16.gmra.mrb[48].mxu1 %vm632_vm3, %v2322_v5 }
 0x307   : > { %1442 = vmatprep.mubr.bf16.mxu0 %v2365_v1  ;;  %1483 = vmatprep.mubr.bf16.mxu1 %v2365_v1 }
 0x3d1   : > { %v1300_v7 = vpop.f32.mrb[44].mxu0  ;;  %v1353_v8 = vpop.f32.mrb[44].mxu1 }
 0x3d2   : > { %v1301_v10 = vadd.f32 %v1300_v7, %v2589_v49  ;;  %v1354_v12 = vadd.f32 %v1353_v8, %v2589_v49  ;;  %v1302_v13 = vpop.f32.mrb[45].mxu0  ;;  %v1355_v14 = vpop.f32.mrb[45].mxu1 }
 0x3d3   : > { %v1303_v15 = vadd.f32 %v1302_v13, %v2589_v49  ;;  %v1356_v16 = vadd.f32 %v1355_v14, %v2589_v49  ;;  %v1304_v17 = vpop.f32.mrb[46].mxu0  ;;  %v1357_v18 = vpop.f32.mrb[46].mxu1 }
 0x3d4   : > { %v1305_v20 = vadd.f32 %v1304_v17, %v1238_v6  ;;  %v1358_v21 = vadd.f32 %v1357_v18, %v1238_v6  ;;  %v1306_v56 = vpop.f32.mrb[47].mxu0  ;;  %v1359_v22 = vpop.f32.mrb[47].mxu1  ;;  %v1372_v25 = vmax.f32 %v1301_v10, 0.0  ;;  %v1374_v26 = vmax.f32 %v1354_v12, 0.0 }
 0x3d5   : > { %v1307_v23 = vadd.f32 %v1306_v56, %v1238_v6  ;;  %v1360_v24 = vadd.f32 %v1359_v22, %v1238_v6  ;;  %v1373_v28 = vmax.f32 %v1303_v15, 0.0  ;;  %v1375_v29 = vmax.f32 %v1356_v16, 0.0  ;;  %v1396_v56 = vld [vmem:[%s2802_s5] sm:$0x1] }
 0x3d6   : > { %v1376_v27 = vmax.f32 %v1305_v20, 0.0  ;;  %v1378_v47 = vmax.f32 %v1358_v21, 0.0  ;;  %v2268_v15 = vcombine.low %v1538_v40, %v1538_v40  ;;  %v2270_v16 = vcombine.low %v1539_v41, %v1539_v41 }
 0x3d7   : > { %v1377_v46 = vmax.f32 %v1307_v23, 0.0  ;;  %v1379_v30 = vmax.f32 %v1360_v24, 0.0  ;;  %v1642_v20 = vand.u32 %v2269_v2, %v2455_v9  ;;  %v1648_v21 = vand.u32 %v2271_v3, %v2455_v9  ;;  %v2327_v24 = vld [vmem:[%s2798_s1] sm:$0xff]  }
 0x3d8   : > { %v1388_v49 = vpack.c.bf16 %v1376_v27, %v1372_v25  ;;  %v1390_v32 = vpack.c.bf16 %v1378_v47, %v1374_v26  ;;  %v1639_v22 = vand.u32 %v2268_v15, %v2455_v9  ;;  %v1645_v23 = vand.u32 %v2270_v16, %v2455_v9  ;;  %v2328_v9 = vld [vmem:[%s2798_s1 + $0x8] sm:$0xff]   ;;  %v2329_v25 = vld [vmem:[%s2798_s1 + $0x10] sm:$0xff]   ;;  %v2330_v26 = vld [vmem:[%s2798_s1 + $0x18] sm:$0xff]   ;;  %v1564_v27 = vpop.permute.xlu1 %1563 }
 0x3d9   : > { %v1389_v33 = vpack.c.bf16 %v1377_v46, %v1373_v28  ;;  %v1391_v34 = vpack.c.bf16 %v1379_v30, %v1375_v29  ;;  %v1310_v57 = vpop.f32.mrb[48].mxu0  ;;  %v1363_v35 = vpop.f32.mrb[48].mxu1 }
 0x3da   : > { %v1311_v36 = vadd.f32 %v1310_v57, %v2591_v50  ;;  %v1364_v37 = vadd.f32 %v1363_v35, %v2591_v50  ;;  %v1312_v38 = vpop.f32.mrb[49].mxu0  ;;  %v1365_v39 = vpop.f32.mrb[49].mxu1 }
 0x3db   : > { %v1313_v42 = vadd.f32 %v1312_v38, %v2591_v50  ;;  %v1366_v43 = vadd.f32 %v1365_v39, %v2591_v50  ;;  %v1314_v45 = vpop.f32.mrb[50].mxu0  ;;  %v1367_v60 = vpop.f32.mrb[50].mxu1  ;;  %1410 = vmatprep.subr.bf16.mxu0 %v1389_v33  ;;  %1451 = vmatprep.subr.bf16.mxu1 %v1391_v34 }
 0x3dc   : > { %v1315_v44 = vadd.f32 %v1314_v45, %v1248_v31  ;;  %v1368_v61 = vadd.f32 %v1367_v60, %v1248_v31  ;;  %v1316_v62 = vpop.f32.mrb[51].mxu0  ;;  %v1369_v48 = vpop.f32.mrb[51].mxu1  ;;  %1411 = vmatpush1.bf16.msra.mxu0 %v1388_v49  ;;  %1452 = vmatpush1.bf16.msra.mxu1 %v1390_v32  ;;  %v1380_v4 = vmax.f32 %v1311_v36, 0.0  ;;  %v1382_v5 = vmax.f32 %v1364_v37, 0.0 }
 0x3dd   : > { %v1317_v63 = vadd.f32 %v1316_v62, %v1248_v31  ;;  %v1370_v0 = vadd.f32 %v1369_v48, %v1248_v31  ;;  %v1381_v8 = vmax.f32 %v1313_v42, 0.0  ;;  %v1383_v50 = vmax.f32 %v1366_v43, 0.0  ;;  %v2707_v47 = vpop.permute.xlu1 %1573 }
 0x3de   : > { %v1384_v6 = vmax.f32 %v1315_v44, 0.0  ;;  %v1386_v7 = vmax.f32 %v1368_v61, 0.0 }
 0x3df   : > { %v1385_v10 = vmax.f32 %v1317_v63, 0.0  ;;  %v1387_v12 = vmax.f32 %v1370_v0, 0.0 }
 0x3e0   : > { %v1392_v13 = vpack.c.bf16 %v1384_v6, %v1380_v4  ;;  %v1394_v14 = vpack.c.bf16 %v1386_v7, %v1382_v5 }
 0x3e1   : > { %v1393_v17 = vpack.c.bf16 %v1385_v10, %v1381_v8  ;;  %v1395_v18 = vpack.c.bf16 %v1387_v12, %v1383_v50  ;;  %v2709_v28 = vpop.permute.xlu1 %1583 }
 0x3e3   : > { %1412 = vmatprep.subr.bf16.mxu0 %v1393_v17  ;;  %1453 = vmatprep.subr.bf16.mxu1 %v1395_v18 }
 0x3e4   : > { %1413 = vmatpush1.bf16.msra.mxu0 %v1392_v13  ;;  %1454 = vmatpush1.bf16.msra.mxu1 %v1394_v14 }
 0x3e5   : > { %1650 = vmatprep.subr.bf16.mxu0 %v1642_v20  ;;  %1723 = vmatprep.subr.bf16.mxu1 %v1648_v21  ;;  %v2711_v29 = vpop.permute.xlu1 %1593 }
 0x3e7   : > { %2262 = vmatmul.mubr.msk.bf16.vlgmr.msra.gmra.mrb[52].mxu0 %vm780_vm4, %v1396_v56  ;;  %2263 = vmatmul.mubr.msk.bf16.vlgmr.msra.gmra.mrb[52].mxu1 %vm780_vm4, %v1396_v56 }
 0x3e8   : > { %1651 = vmatpush1.bf16.msra.mxu0 %v1639_v22  ;;  %1724 = vmatpush1.bf16.msra.mxu1 %v1645_v23 }
 0x3e9   : > { %1682 = vmatprep.mubr.bf16.mxu0 %v2365_v1  ;;  %1755 = vmatprep.mubr.bf16.mxu1 %v2365_v1  ;;  %v2713_v46 = vpop.permute.xlu1 %1859 }
 0x3ed   : > { %v2715_v30 = vpop.permute.xlu1 %1869 }
 0x3ef   : > { %2272 = vmatmul.mubr.msk.bf16.vlgmr.msra.gmra.mrb[56].mxu0 %vm371_vm2, %v2327_v24  ;;  %2276 = vmatmul.mubr.msk.bf16.vlgmr.msra.gmra.mrb[56].mxu1 %vm371_vm2, %v2327_v24 }
 0x3f0   : > { %1692 = vmatprep.mubr.bf16.mxu0 %v2365_v1  ;;  %1765 = vmatprep.mubr.bf16.mxu1 %v2365_v1 }
 0x3f1   : > { %v1401_v31 = vpop.permute.xlu1 %1400 }
 0x3f2   : > { %v1406_v49 = vrot.slane %v1401_v31, %v2609_v59 }
 0x3f7   : > { %2273 = vmatmul.mubr.msk.bf16.gmra.mrb[60].mxu0 %vm371_vm2, %v2328_v9  ;;  %2277 = vmatmul.mubr.msk.bf16.gmra.mrb[60].mxu1 %vm371_vm2, %v2328_v9 }
 0x3f8   : > { %1702 = vmatprep.mubr.bf16.mxu0 %v2365_v1  ;;  %1775 = vmatprep.mubr.bf16.mxu1 %v2365_v1 }
 0x3ff   : > { %2274 = vmatmul.mubr.msk.bf16.gmra.mrb[64].mxu0 %vm371_vm2, %v2329_v25  ;;  %2278 = vmatmul.mubr.msk.bf16.gmra.mrb[64].mxu1 %vm371_vm2, %v2329_v25 }
 0x400   : > { %1712 = vmatprep.mubr.bf16.mxu0 %v2365_v1  ;;  %1785 = vmatprep.mubr.bf16.mxu1 %v2365_v1 }
 0x407   : > { %2275 = vmatmul.mubr.msk.bf16.gmra.mrb[68].mxu0 %vm371_vm2, %v2330_v26  ;;  %2279 = vmatmul.mubr.msk.bf16.gmra.mrb[68].mxu1 %vm371_vm2, %v2330_v26 }
 0x408   : > { %1920 = vmatprep.mubr.bf16.mxu0 %v2365_v1  ;;  %1973 = vmatprep.mubr.bf16.mxu1 %v2365_v1 }
 0x4ba   : > { %v1444_v32 = vpop.f32.mrb[52].mxu0  ;;  %v1485_v33 = vpop.f32.mrb[52].mxu1 }
 0x4bb   : > { %v1445_v34 = vadd.f32 %v1444_v32, %v1406_v49  ;;  %v1486_v57 = vadd.f32 %v1485_v33, %v1406_v49  ;;  %v1446_v35 = vpop.f32.mrb[53].mxu0  ;;  %v1487_v36 = vpop.f32.mrb[53].mxu1 }
 0x4bc   : > { %v1447_v37 = vadd.f32 %v1446_v35, %v1406_v49  ;;  %v1488_v38 = vadd.f32 %v1487_v36, %v1406_v49  ;;  %v1448_v39 = vpop.f32.mrb[54].mxu0  ;;  %v1489_v40 = vpop.f32.mrb[54].mxu1 }
 0x4bd   : > { %v1492_v41 = vmul.f32 0.5, %v1445_v34  ;;  %v1494_v42 = vmul.f32 0.5, %v1486_v57  ;;  %v1449_v43 = vpop.f32.mrb[55].mxu0  ;;  %v1490_v45 = vpop.f32.mrb[55].mxu1 }
 0x4be   : > { %v1493_v60 = vmul.f32 0.5, %v1447_v37  ;;  %v1495_v44 = vmul.f32 0.5, %v1488_v38 }
 0x4bf   : > { %2341 = vtanh.f32 %v1492_v41 }
 0x4c0   : > { %2343 = vtanh.f32 %v1494_v42 }
 0x4c1   : > { %2345 = vtanh.f32 %v1493_v60 }
 0x4c2   : > { %2347 = vtanh.f32 %v1495_v44  ;;  %v1684_v61 = vpop.f32.mrb[56].mxu0  ;;  %v1757_v62 = vpop.f32.mrb[56].mxu1 }
 0x4c3   : > { %v1685_v48 = vadd.f32 %v1684_v61, %v2593_v51  ;;  %v1758_v63 = vadd.f32 %v1757_v62, %v2593_v51  ;;  %v1686_v0 = vpop.f32.mrb[57].mxu0  ;;  %v1759_v2 = vpop.f32.mrb[57].mxu1 }
 0x4c4   : > { %v1687_v3 = vadd.f32 %v1686_v0, %v2593_v51  ;;  %v1760_v4 = vadd.f32 %v1759_v2, %v2593_v51  ;;  %v1688_v5 = vpop.f32.mrb[58].mxu0  ;;  %v1761_v6 = vpop.f32.mrb[58].mxu1 }
 0x4c5   : > { %v1689_v7 = vadd.f32 %v1688_v5, %v1564_v27  ;;  %v1762_v8 = vadd.f32 %v1761_v6, %v1564_v27  ;;  %v1690_v50 = vpop.f32.mrb[59].mxu0  ;;  %v1763_v10 = vpop.f32.mrb[59].mxu1  ;;  %v1796_v14 = vmax.f32 %v1685_v48, 0.0  ;;  %v1798_v15 = vmax.f32 %v1758_v63, 0.0 }
 0x4c6   : > { %v1691_v12 = vadd.f32 %v1690_v50, %v1564_v27  ;;  %v1764_v13 = vadd.f32 %v1763_v10, %v1564_v27  ;;  %v1797_v18 = vmax.f32 %v1687_v3, 0.0  ;;  %v1799_v20 = vmax.f32 %v1760_v4, 0.0 }
 0x4c7   : > { %v1800_v16 = vmax.f32 %v1689_v7, 0.0  ;;  %v1802_v17 = vmax.f32 %v1762_v8, 0.0 }
 0x4c8   : > { %v1801_v21 = vmax.f32 %v1691_v12, 0.0  ;;  %v1803_v56 = vmax.f32 %v1764_v13, 0.0 }
 0x4c9   : > { %v2342_v22 = vpop.eup %2341  ;;  %v1828_v23 = vpack.c.bf16 %v1800_v16, %v1796_v14  ;;  %v1830_v24 = vpack.c.bf16 %v1802_v17, %v1798_v15 }
 0x4ca   : > { %v2344_v51 = vpop.eup %2343  ;;  %v1500_v9 = vadd.f32 1.0, %v2342_v22  ;;  %v1829_v25 = vpack.c.bf16 %v1801_v21, %v1797_v18  ;;  %v1831_v26 = vpack.c.bf16 %v1803_v56, %v1799_v20  ;;  %v1694_v31 = vpop.f32.mrb[60].mxu0 }
 0x4cb   : > { %v1767_v49 = vpop.f32.mrb[60].mxu1  ;;  %v2346_v32 = vpop.eup %2345  ;;  %v1502_v33 = vadd.f32 1.0, %v2344_v51  ;;  %v1695_v27 = vadd.f32 %v1694_v31, %v2595_v52 }
 0x4cc   : > { %v1768_v34 = vadd.f32 %v1767_v49, %v2595_v52  ;;  %v1696_v57 = vpop.f32.mrb[61].mxu0  ;;  %v1769_v35 = vpop.f32.mrb[61].mxu1  ;;  %v1504_v37 = vmul.f32 0.5, %v1500_v9  ;;  %v1501_v38 = vadd.f32 1.0, %v2346_v32  ;;  %1888 = vmatprep.subr.bf16.mxu0 %v1829_v25  ;;  %1941 = vmatprep.subr.bf16.mxu1 %v1831_v26 }
 0x4cd   : > { %v2348_v36 = vpop.eup %2347  ;;  %v1697_v39 = vadd.f32 %v1696_v57, %v2595_v52  ;;  %v1770_v40 = vadd.f32 %v1769_v35, %v2595_v52  ;;  %v1698_v41 = vpop.f32.mrb[62].mxu0  ;;  %v1506_v43 = vmul.f32 0.5, %v1502_v33  ;;  %1889 = vmatpush1.bf16.msra.mxu0 %v1828_v23  ;;  %1942 = vmatpush1.bf16.msra.mxu1 %v1830_v24  ;;  %v1804_v62 = vmax.f32 %v1695_v27, 0.0 }
 0x4ce   : > { %v1771_v42 = vpop.f32.mrb[62].mxu1  ;;  %v1503_v45 = vadd.f32 1.0, %v2348_v36  ;;  %v1700_v60 = vpop.f32.mrb[63].mxu0  ;;  %v1505_v61 = vmul.f32 0.5, %v1501_v38  ;;  %v1806_v48 = vmax.f32 %v1768_v34, 0.0  ;;  %v1699_v63 = vadd.f32 %v1698_v41, %v2707_v47 }
 0x4cf   : > { %v1773_v44 = vpop.f32.mrb[63].mxu1  ;;  %v1772_v2 = vadd.f32 %v1771_v42, %v2707_v47  ;;  %v1701_v52 = vadd.f32 %v1700_v60, %v2707_v47  ;;  %v1805_v5 = vmax.f32 %v1697_v39, 0.0  ;;  %v1807_v6 = vmax.f32 %v1770_v40, 0.0 }
 0x4d0   : > { %v1507_v0 = vmul.f32 0.5, %v1503_v45  ;;  %v1774_v3 = vadd.f32 %v1773_v44, %v2707_v47  ;;  %v1512_v4 = vcombine.low %v1504_v37, %v1505_v61  ;;  %v1808_v7 = vmax.f32 %v1699_v63, 0.0 }
 0x4d1   : > { %v1810_v50 = vmax.f32 %v1772_v2, 0.0  ;;  %v1809_v10 = vmax.f32 %v1701_v52, 0.0 }
 0x4d2   : > { %v1513_v8 = vcombine.low %v1506_v43, %v1507_v0  ;;  %v1811_v12 = vmax.f32 %v1774_v3, 0.0  ;;  %v1520_v13 = vrot.slane %v1512_v4, %v2617_v19  ;;  %v1832_v14 = vpack.c.bf16 %v1808_v7, %v1804_v62  ;;  %v1704_v15 = vpop.f32.mrb[64].mxu0  ;;  %v1777_v16 = vpop.f32.mrb[64].mxu1 }
 0x4d3   : > { %v1834_v18 = vpack.c.bf16 %v1810_v50, %v1806_v48  ;;  %v1833_v20 = vpack.c.bf16 %v1809_v10, %v1805_v5  ;;  %v1706_v56 = vpop.f32.mrb[65].mxu0  ;;  %v1779_v47 = vpop.f32.mrb[65].mxu1  ;;  %v1705_v22 = vadd.f32 %v1704_v15, %v2597_v53  ;;  %v1778_v23 = vadd.f32 %v1777_v16, %v2597_v53 }
 0x4d4   : > { %v1527_v17 = vrot.slane %v1513_v8, %v2617_v19  ;;  %v1835_v21 = vpack.c.bf16 %v1811_v12, %v1807_v6  ;;  %v1707_v24 = vadd.f32 %v1706_v56, %v2597_v53  ;;  %v1708_v51 = vpop.f32.mrb[66].mxu0  ;;  %v1781_v9 = vpop.f32.mrb[66].mxu1  ;;  %v1780_v34 = vadd.f32 %v1779_v47, %v2597_v53  ;;  %v2332_v47 = vld [vmem:[%s2800_s3 + $0x8] sm:$0xff]  }
 0x4d5   : > { %v1709_v26 = vadd.f32 %v1708_v51, %v2709_v28  ;;  %v1782_v31 = vadd.f32 %v1781_v9, %v2709_v28  ;;  %1890 = vmatprep.subr.bf16.mxu0 %v1833_v20  ;;  %v1710_v49 = vpop.f32.mrb[67].mxu0  ;;  %v1783_v32 = vpop.f32.mrb[67].mxu1  ;;  %v1812_v33 = vmax.f32 %v1705_v22, 0.0  ;;  %v1814_v27 = vmax.f32 %v1778_v23, 0.0 }
 0x4d6   : > { %v1528_v25 = vcombine.low %v1520_v13, %v1527_v17  ;;  %1943 = vmatprep.subr.bf16.mxu1 %v1835_v21  ;;  %1891 = vmatpush1.bf16.msra.mxu0 %v1832_v14  ;;  %v1711_v37 = vadd.f32 %v1710_v49, %v2709_v28  ;;  %v1784_v38 = vadd.f32 %v1783_v32, %v2709_v28  ;;  %v1813_v39 = vmax.f32 %v1707_v24, 0.0 }
 0x4d7   : > { %1944 = vmatpush1.bf16.msra.mxu1 %v1834_v18  ;;  %v1816_v35 = vmax.f32 %v1709_v26, 0.0  ;;  %v1818_v36 = vmax.f32 %v1782_v31, 0.0  ;;  %v1815_v43 = vmax.f32 %v1780_v34, 0.0 }
 0x4d8   : > { %v1535_v57 = vrot.slane %v1528_v25, %v2617_v19  ;;  %v1817_v42 = vmax.f32 %v1711_v37, 0.0  ;;  %v1819_v45 = vmax.f32 %v1784_v38, 0.0 }
 0x4d9   : > { %v1836_v40 = vpack.c.bf16 %v1816_v35, %v1812_v33  ;;  %v1838_v41 = vpack.c.bf16 %v1818_v36, %v1814_v27 }
 0x4da   : > { %1537 = vst.msk [vmem:[%s2628_s15 + $0x4] sm:$0xf] %vm2631_vm5, %v1535_v57  ;;  %v1714_v53 = vpop.f32.mrb[68].mxu0  ;;  %v1787_v60 = vpop.f32.mrb[68].mxu1  ;;  %v1837_v44 = vpack.c.bf16 %v1817_v42, %v1813_v39  ;;  %v1839_v0 = vpack.c.bf16 %v1819_v45, %v1815_v43 }
 0x4db   : > { %v1715_v61 = vadd.f32 %v1714_v53, %v2599_v54  ;;  %v1788_v62 = vadd.f32 %v1787_v60, %v2599_v54  ;;  %v1716_v48 = vpop.f32.mrb[69].mxu0  ;;  %v1789_v63 = vpop.f32.mrb[69].mxu1 }
 0x4dc   : > { %v1717_v28 = vadd.f32 %v1716_v48, %v2599_v54  ;;  %v1790_v2 = vadd.f32 %v1789_v63, %v2599_v54  ;;  %v1718_v52 = vpop.f32.mrb[70].mxu0  ;;  %v1791_v3 = vpop.f32.mrb[70].mxu1  ;;  %1892 = vmatprep.subr.bf16.mxu0 %v1837_v44  ;;  %1945 = vmatprep.subr.bf16.mxu1 %v1839_v0 }
 0x4dd   : > { %v1719_v4 = vadd.f32 %v1718_v52, %v2711_v29  ;;  %v1792_v5 = vadd.f32 %v1791_v3, %v2711_v29  ;;  %v1720_v6 = vpop.f32.mrb[71].mxu0  ;;  %v1793_v7 = vpop.f32.mrb[71].mxu1  ;;  %1893 = vmatpush1.bf16.msra.mxu0 %v1836_v40  ;;  %v1820_v10 = vmax.f32 %v1715_v61, 0.0  ;;  %v1822_v12 = vmax.f32 %v1788_v62, 0.0  ;;  %1946 = vmatpush1.bf16.msra.mxu1 %v1838_v41 }
 0x4de   : > { %v1721_v8 = vadd.f32 %v1720_v6, %v2711_v29  ;;  %v1794_v50 = vadd.f32 %v1793_v7, %v2711_v29  ;;  %v1821_v54 = vmax.f32 %v1717_v28, 0.0  ;;  %v1823_v15 = vmax.f32 %v1790_v2, 0.0  ;;  %v2331_v29 = vld [vmem:[%s2800_s3] sm:$0xff]  }
 0x4df   : > { %v1824_v13 = vmax.f32 %v1719_v4, 0.0  ;;  %v1826_v14 = vmax.f32 %v1792_v5, 0.0 }
 0x4e0   : > { %v1825_v16 = vmax.f32 %v1721_v8, 0.0  ;;  %v1827_v17 = vmax.f32 %v1794_v50, 0.0 }
 0x4e1   : > { %v1840_v18 = vpack.c.bf16 %v1824_v13, %v1820_v10  ;;  %v1842_v20 = vpack.c.bf16 %v1826_v14, %v1822_v12 }
 0x4e2   : > { %v1841_v21 = vpack.c.bf16 %v1825_v16, %v1821_v54  ;;  %v1843_v56 = vpack.c.bf16 %v1827_v17, %v1823_v15 }
 0x4e4   : > { %1894 = vmatprep.subr.bf16.mxu0 %v1841_v21  ;;  %1947 = vmatprep.subr.bf16.mxu1 %v1843_v56  ;;  %v2023_v21 = vpop.permute.xlu0 %2022 }
 0x4e5   : > { %1895 = vmatpush1.bf16.msra.mxu0 %v1840_v18  ;;  %1948 = vmatpush1.bf16.msra.mxu1 %v1842_v20  ;;  %v2028_v56 = vrot.slane %v2023_v21, %v2609_v59 }
 0x4e8   : > { %2282 = vmatmul.mubr.msk.bf16.vlgmr.msra.gmra.mrb[72].mxu0 %vm632_vm3, %v2331_v29  ;;  %2284 = vmatmul.mubr.msk.bf16.vlgmr.msra.gmra.mrb[72].mxu1 %vm632_vm3, %v2331_v29 }
 0x4e9   : > { %1930 = vmatprep.mubr.bf16.mxu0 %v2365_v1  ;;  %1983 = vmatprep.mubr.bf16.mxu1 %v2365_v1 }
 0x4f0   : > { %2283 = vmatmul.mubr.msk.bf16.gmra.mrb[76].mxu0 %vm632_vm3, %v2332_v47  ;;  %2285 = vmatmul.mubr.msk.bf16.gmra.mrb[76].mxu1 %vm632_vm3, %v2332_v47 }
 0x4f1   : > { %2064 = vmatprep.mubr.bf16.mxu0 %v2365_v1  ;;  %2105 = vmatprep.mubr.bf16.mxu1 %v2365_v1 }
 0x5bb   : > { %v1922_v22 = vpop.f32.mrb[72].mxu0  ;;  %v1975_v23 = vpop.f32.mrb[72].mxu1 }
 0x5bc   : > { %v1923_v24 = vadd.f32 %v1922_v22, %v2601_v55  ;;  %v1976_v51 = vadd.f32 %v1975_v23, %v2601_v55  ;;  %v1924_v9 = vpop.f32.mrb[73].mxu0  ;;  %v1977_v25 = vpop.f32.mrb[73].mxu1 }
 0x5bd   : > { %v1925_v26 = vadd.f32 %v1924_v9, %v2601_v55  ;;  %v1978_v31 = vadd.f32 %v1977_v25, %v2601_v55  ;;  %v1926_v49 = vpop.f32.mrb[74].mxu0  ;;  %v1979_v32 = vpop.f32.mrb[74].mxu1 }
 0x5be   : > { %v1927_v33 = vadd.f32 %v1926_v49, %v2713_v46  ;;  %v1980_v27 = vadd.f32 %v1979_v32, %v2713_v46  ;;  %v1928_v34 = vpop.f32.mrb[75].mxu0  ;;  %v1981_v1 = vpop.f32.mrb[75].mxu1  ;;  %v1994_v36 = vmax.f32 %v1923_v24, 0.0  ;;  %v1996_v37 = vmax.f32 %v1976_v51, 0.0 }
 0x5bf   : > { %v1929_v57 = vadd.f32 %v1928_v34, %v2713_v46  ;;  %v1982_v35 = vadd.f32 %v1981_v1, %v2713_v46  ;;  %v1995_v40 = vmax.f32 %v1925_v26, 0.0  ;;  %v1997_v41 = vmax.f32 %v1978_v31, 0.0 }
 0x5c0   : > { %v1998_v38 = vmax.f32 %v1927_v33, 0.0  ;;  %v2000_v39 = vmax.f32 %v1980_v27, 0.0 }
 0x5c1   : > { %v1999_v42 = vmax.f32 %v1929_v57, 0.0  ;;  %v2001_v55 = vmax.f32 %v1982_v35, 0.0 }
 0x5c2   : > { %v2010_v43 = vpack.c.bf16 %v1998_v38, %v1994_v36  ;;  %v2012_v45 = vpack.c.bf16 %v2000_v39, %v1996_v37 }
 0x5c3   : > { %v2011_v53 = vpack.c.bf16 %v1999_v42, %v1995_v40  ;;  %v2013_v60 = vpack.c.bf16 %v2001_v55, %v1997_v41  ;;  %v1932_v44 = vpop.f32.mrb[76].mxu0  ;;  %v1985_v61 = vpop.f32.mrb[76].mxu1 }
 0x5c4   : > { %v1933_v62 = vadd.f32 %v1932_v44, %v2606_v58  ;;  %v1986_v48 = vadd.f32 %v1985_v61, %v2606_v58  ;;  %v1934_v63 = vpop.f32.mrb[77].mxu0  ;;  %v1987_v46 = vpop.f32.mrb[77].mxu1 }
 0x5c5   : > { %v1935_v0 = vadd.f32 %v1934_v63, %v2606_v58  ;;  %v1988_v28 = vadd.f32 %v1987_v46, %v2606_v58  ;;  %v1936_v2 = vpop.f32.mrb[78].mxu0  ;;  %v1989_v52 = vpop.f32.mrb[78].mxu1  ;;  %2032 = vmatprep.subr.bf16.mxu0 %v2011_v53  ;;  %2073 = vmatprep.subr.bf16.mxu1 %v2013_v60 }
 0x5c6   : > { %v1937_v3 = vadd.f32 %v1936_v2, %v2715_v30  ;;  %v1990_v4 = vadd.f32 %v1989_v52, %v2715_v30  ;;  %v1938_v5 = vpop.f32.mrb[79].mxu0  ;;  %v1991_v6 = vpop.f32.mrb[79].mxu1  ;;  %2033 = vmatpush1.bf16.msra.mxu0 %v2010_v43  ;;  %2074 = vmatpush1.bf16.msra.mxu1 %v2012_v45  ;;  %v2002_v50 = vmax.f32 %v1933_v62, 0.0  ;;  %v2004_v10 = vmax.f32 %v1986_v48, 0.0 }
 0x5c7   : > { %v1939_v7 = vadd.f32 %v1938_v5, %v2715_v30  ;;  %v1992_v8 = vadd.f32 %v1991_v6, %v2715_v30  ;;  %v2003_v13 = vmax.f32 %v1935_v0, 0.0  ;;  %v2005_v14 = vmax.f32 %v1988_v28, 0.0  ;;  %v2018_v30 = vld [vmem:[%s2802_s5] sm:$0x1] }
 0x5c8   : > { %v2006_v12 = vmax.f32 %v1937_v3, 0.0  ;;  %v2008_v58 = vmax.f32 %v1990_v4, 0.0 }
 0x5c9   : > { %v2007_v54 = vmax.f32 %v1939_v7, 0.0  ;;  %v2009_v15 = vmax.f32 %v1992_v8, 0.0 }
 0x5ca   : > { %v2014_v16 = vpack.c.bf16 %v2006_v12, %v2002_v50  ;;  %v2016_v17 = vpack.c.bf16 %v2008_v58, %v2004_v10 }
 0x5cb   : > { %v2015_v18 = vpack.c.bf16 %v2007_v54, %v2003_v13  ;;  %v2017_v20 = vpack.c.bf16 %v2009_v15, %v2005_v14 }
 0x5cd   : > { %2034 = vmatprep.subr.bf16.mxu0 %v2015_v18  ;;  %2075 = vmatprep.subr.bf16.mxu1 %v2017_v20 }
 0x5ce   : > { %2035 = vmatpush1.bf16.msra.mxu0 %v2014_v16  ;;  %2076 = vmatpush1.bf16.msra.mxu1 %v2016_v17 }
 0x5d1   : > { %2286 = vmatmul.mubr.msk.bf16.vlgmr.msra.gmra.mrb[80].mxu0 %vm780_vm4, %v2018_v30  ;;  %2287 = vmatmul.mubr.msk.bf16.vlgmr.msra.gmra.mrb[80].mxu1 %vm780_vm4, %v2018_v30 }
 0x6a4   : > { %v2066_v29 = vpop.f32.mrb[80].mxu0  ;;  %v2107_v47 = vpop.f32.mrb[80].mxu1 }
 0x6a5   : > { %v2067_v22 = vadd.f32 %v2066_v29, %v2028_v56  ;;  %v2108_v23 = vadd.f32 %v2107_v47, %v2028_v56  ;;  %v2068_v24 = vpop.f32.mrb[81].mxu0  ;;  %v2109_v51 = vpop.f32.mrb[81].mxu1 }
 0x6a6   : > { %v2069_v9 = vadd.f32 %v2068_v24, %v2028_v56  ;;  %v2110_v25 = vadd.f32 %v2109_v51, %v2028_v56  ;;  %v2070_v26 = vpop.f32.mrb[82].mxu0  ;;  %v2111_v31 = vpop.f32.mrb[82].mxu1 }
 0x6a7   : > { %v2114_v49 = vmul.f32 0.5, %v2067_v22  ;;  %v2116_v32 = vmul.f32 0.5, %v2108_v23  ;;  %v2071_v33 = vpop.f32.mrb[83].mxu0  ;;  %v2112_v27 = vpop.f32.mrb[83].mxu1 }
 0x6a8   : > { %v2115_v34 = vmul.f32 0.5, %v2069_v9  ;;  %v2117_v1 = vmul.f32 0.5, %v2110_v25 }
 0x6a9   : > { %2349 = vtanh.f32 %v2114_v49 }
 0x6aa   : > { %2351 = vtanh.f32 %v2116_v32 }
 0x6ab   : > { %2353 = vtanh.f32 %v2115_v34 }
 0x6ac   : > { %2355 = vtanh.f32 %v2117_v1 }
 0x6b3   : > { %v2350_v59 = vpop.eup %2349 }
 0x6b4   : > { %v2352_v57 = vpop.eup %2351  ;;  %v2122_v35 = vadd.f32 1.0, %v2350_v59 }
 0x6b5   : > { %v2354_v36 = vpop.eup %2353  ;;  %v2124_v37 = vadd.f32 1.0, %v2352_v57 }
 0x6b6   : > { %v2356_v38 = vpop.eup %2355  ;;  %v2126_v39 = vmul.f32 0.5, %v2122_v35  ;;  %v2123_v40 = vadd.f32 1.0, %v2354_v36 }
 0x6b7   : > { %v2128_v41 = vmul.f32 0.5, %v2124_v37  ;;  %v2125_v42 = vadd.f32 1.0, %v2356_v38 }
 0x6b8   : > { %v2127_v55 = vmul.f32 0.5, %v2123_v40 }
 0x6b9   : > { %v2129_v43 = vmul.f32 0.5, %v2125_v42 }
 0x6ba   : > { %v2134_v45 = vcombine.low %v2126_v39, %v2127_v55 }
 0x6bb   : > { %v2135_v53 = vcombine.low %v2128_v41, %v2129_v43 }
 0x6bc   : > { %v2142_v60 = vrot.slane %v2134_v45, %v2617_v19 }
 0x6bd   : > { %v2149_v44 = vrot.slane %v2135_v53, %v2617_v19 }
 0x6bf   : > { %v2150_v61 = vcombine.low %v2142_v60, %v2149_v44 }
 0x6c1   : > { %v2157_v62 = vrot.slane %v2150_v61, %v2617_v19 }
 0x6c3   : > { %2159 = vst.msk [vmem:[%s2628_s15 + $0x8] sm:$0xf] %vm2631_vm5, %v2157_v62 }
 0x6c4 PF: > { %s19_s26 = sadd.s32 1, %s2363_s26  }
 0x6c5   : > { %p16_p4 = scmp.ge.s32.totalorder %s19_s26, 4  }
 0x6c7   :  { %18 = sbr.rel (!%p16_p4) target bundleno = 3 (0x3), region = 78 }

</bundles_post_ra>
